<compile_context>
chip_gen: v7x
topology: tpu7x:2x2x1
jax: 0.10.0
libtpu: 0.0.40
codegen_flags: <defaults>
</compile_context>

<pallas_src>
import jax
import jax.numpy as jnp
from jax.experimental import pallas as pl
from jax.experimental.pallas import tpu as pltpu

# ----------------------------- model hyper-params -----------------------------
D_IN = 16
D_LATENT = 32
D_HIDDEN = 128
D_OUT = 4
N_BLOCKS = 5
D_ZX = D_LATENT + D_IN                    # 48
D_FUSE = D_HIDDEN + D_ZX                  # 176: [relu(net) | zx] fused fc_1 K
# TODO(synk): combine_interleaved / use_spade / Softplus(beta>0) branches are
#             dead for this config, so they are not lowered to the kernel.

# Max row-tile.  Post-restructure the live per-step set is a few (TM, 128)
# buffers (~2-4 MB at 2048 rows), so 2048 fits comfortably in the 32 MiB scoped
# VMEM default on v5e/v6e/v7x while amortizing the ~0.35 us per-step overhead.
TM_MAX = 2048


def _round_up(x, m):
    return ((x + m - 1) // m) * m


def _cdiv(a, b):
    return -(-a // b)


# --------------------------------- kernel -------------------------------------
def resnetfc_kernel(
    zx_ref,       # (TM, D_ZX)                           bf16
    w_first_ref,  # (D_ZX, D_HIDDEN)                     bf16  [wz[0]; w_in]
    b_first_ref,  # (1, D_HIDDEN)                        f32   b_in + bz[0]
    w0_ref,       # (N_BLOCKS, D_HIDDEN, D_HIDDEN)       bf16  fc_0
    b0_ref,       # (N_BLOCKS, 1, D_HIDDEN)              f32
    w1z_ref,      # (N_BLOCKS-1, D_FUSE, D_HIDDEN)       bf16  [w1[k]; wz[k+1]; 0]
    b1z_ref,      # (N_BLOCKS-1, 1, D_HIDDEN)            f32   b1[k] + bz[k+1]
    w1_last_ref,  # (D_HIDDEN, D_HIDDEN)                 bf16  w1[N-1]
    b1_last_ref,  # (1, D_HIDDEN)                        f32
    w_out_ref,    # (D_HIDDEN, D_OUT)                    bf16
    b_out_ref,    # (1, D_OUT)                           f32
    out_ref,      # (TM, D_OUT)                          f32
):
    bf16 = jnp.bfloat16
    f32 = jnp.float32

    zx = zx_ref[...]                                              # (TM, 48) bf16

    # x = lin_in(x_in) + lin_z[0](z), fused into one K=48 matmul.
    x = jnp.dot(zx, w_first_ref[...], preferred_element_type=f32)
    x = x + b_first_ref[...]

    # Residual blocks (static unroll: N_BLOCKS is a compile-time constant).
    for blk in range(N_BLOCKS):
        # net = fc_0(relu(x))
        net = jnp.dot(jnp.maximum(x, 0.0).astype(bf16), w0_ref[blk],
                      preferred_element_type=f32) + b0_ref[blk]
        relu_net = jnp.maximum(net, 0.0).astype(bf16)             # (TM, 128)
        if blk < N_BLOCKS - 1:
            # dx_k + lin_z[k+1](z) in ONE matmul:
            #   [relu(net) | zx] @ [w1[k]; wz[k+1]; 0]  (K = 176, N = 128)
            lhs = jnp.concatenate([relu_net, zx], axis=1)         # (TM, 176)
            x = x + (jnp.dot(lhs, w1z_ref[blk],
                             preferred_element_type=f32) + b1z_ref[blk])
        else:
            # Last block: no following injection, plain 128x128 fc_1.
            x = x + (jnp.dot(relu_net, w1_last_ref[...],
                             preferred_element_type=f32) + b1_last_ref[...])

    # lin_out(relu(x)) -- narrow (TM, 4) store, amortized by the large row tile.
    out = jnp.dot(jnp.maximum(x, 0.0).astype(bf16), w_out_ref[...],
                  preferred_element_type=f32) + b_out_ref[...]
    out_ref[...] = out.astype(out_ref.dtype)


# --------------------------------- wrapper ------------------------------------
def _pack_params(params):
    """Fuse lin_in+lin_z[0], and fold each lin_z[k+1] into block k's fc_1."""
    (w_in, b_in, wz, bz, w0, b0, w1, b1, w_out, b_out) = params
    f32 = jnp.float32
    bf16 = jnp.bfloat16

    # zx layout along the feature axis is [z (0:32) | x_in (32:48)].
    w_first = jnp.concatenate([wz[0], w_in], axis=0).astype(bf16)    # (48, 128)
    b_first = (b_in + bz[0]).astype(f32)                             # (1, 128)

    # Block k (k < N-1) fc_1 fused with the k+1 latent injection:
    #   rows 0:128   -> w1[k]        (applied to relu(net))
    #   rows 128:160 -> wz[k+1]      (applied to z part of zx)
    #   rows 160:176 -> zeros        (x_in part of zx contributes nothing)
    w1z, b1z = [], []
    for k in range(N_BLOCKS - 1):
        wz_pad = jnp.concatenate(
            [wz[k + 1], jnp.zeros((D_IN, D_HIDDEN), f32)], axis=0)   # (48, 128)
        w1z.append(jnp.concatenate([w1[k], wz_pad], axis=0))         # (176, 128)
        b1z.append(b1[k] + bz[k + 1])                                # (1, 128)
    w1z = jnp.stack(w1z).astype(bf16)          # (N_BLOCKS-1, 176, 128)
    b1z = jnp.stack(b1z).astype(f32)           # (N_BLOCKS-1, 1, 128)

    w1_last = w1[N_BLOCKS - 1].astype(bf16)    # (128, 128)
    b1_last = b1[N_BLOCKS - 1].astype(f32)     # (1, 128)

    return (w_first, b_first,
            w0.astype(bf16), b0.astype(f32),
            w1z, b1z, w1_last, b1_last,
            w_out.astype(bf16), b_out.astype(f32))


@jax.jit
def resnetfc_forward(zx, params):
    """zx: (..., D_LATENT + D_IN) -> (..., D_OUT)"""
    orig_shape = zx.shape
    assert orig_shape[-1] == D_ZX
    zx2 = zx.reshape(-1, D_ZX).astype(jnp.bfloat16)
    n = zx2.shape[0]

    # Grid-aware, padding-balanced tile selection:
    #   * >= 2 grid steps whenever n > 16 (both v7x TCs used, pipelining on)
    #   * padding waste bounded by <16 rows (balanced tile vs round_up(n, TM))
    ntiles = max(2, _cdiv(n, TM_MAX))
    tm = min(TM_MAX, _round_up(_cdiv(n, ntiles), 16))    # 16 = bf16 sublane pack
    n_pad = _round_up(n, tm)
    if n_pad != n:
        zx2 = jnp.pad(zx2, ((0, n_pad - n), (0, 0)))

    packed = _pack_params(params)
    (w_first, b_first, w0, b0, w1z, b1z, w1_last, b1_last, w_out, b_out) = packed

    def full(a):
        nd = a.ndim
        return pl.BlockSpec(a.shape, lambda i, nd=nd: (0,) * nd)

    out = pl.pallas_call(
        resnetfc_kernel,
        out_shape=jax.ShapeDtypeStruct((n_pad, D_OUT), jnp.float32),
        grid=(n_pad // tm,),
        in_specs=[
            pl.BlockSpec((tm, D_ZX), lambda i: (i, 0)),
            full(w_first), full(b_first),
            full(w0), full(b0),
            full(w1z), full(b1z),
            full(w1_last), full(b1_last),
            full(w_out), full(b_out),
        ],
        # Narrow (tm, 4) output kept on purpose: masked stores are ~free next to
        # the MXU work; padding to 128 lanes would 32x the HBM writeback.
        out_specs=pl.BlockSpec((tm, D_OUT), lambda i: (i, 0)),
        compiler_params=pltpu.CompilerParams(
            dimension_semantics=("parallel",),
        ),
    )(zx2, w_first, b_first, w0, b0, w1z, b1z, w1_last, b1_last, w_out, b_out)

    out = out[:n]
    return out.reshape(*orig_shape[:-1], D_OUT)


# ------------------------- deterministic parameter init -----------------------
def kaiming_normal(key, fan_in, fan_out):
    # PyTorch kaiming_normal_(a=0, mode='fan_in'): std = sqrt(2 / fan_in),
    # weight shape (out, in).  Returned transposed to (in, out) so the kernel
    # computes x @ W + b (== PyTorch's x @ weight.T + bias).
    std = (2.0 / fan_in) ** 0.5
    w = std * jax.random.normal(key, (fan_out, fan_in), dtype=jnp.float32)
    return w.T


def init_params(key, random_fc1=False):
    keys = jax.random.split(key, 2 + 3 * N_BLOCKS)
    k_iter = iter(keys)

    # lin_in: Linear(d_in, d_hidden), kaiming fan_in, bias 0
    w_in = kaiming_normal(next(k_iter), D_IN, D_HIDDEN)
    b_in = jnp.zeros((1, D_HIDDEN), jnp.float32)

    # lin_z[i]: Linear(d_latent, d_hidden), kaiming fan_in, bias 0
    wz = jnp.stack([kaiming_normal(next(k_iter), D_LATENT, D_HIDDEN)
                    for _ in range(N_BLOCKS)])
    bz = jnp.zeros((N_BLOCKS, 1, D_HIDDEN), jnp.float32)

    # ResnetBlockFC: fc_0 kaiming fan_in / bias 0, fc_1 zero weight / bias 0
    w0 = jnp.stack([kaiming_normal(next(k_iter), D_HIDDEN, D_HIDDEN)
                    for _ in range(N_BLOCKS)])
    b0 = jnp.zeros((N_BLOCKS, 1, D_HIDDEN), jnp.float32)
    if random_fc1:
        # test-only variant so the fc_1 path / second ReLU are exercised
        w1 = jnp.stack([kaiming_normal(next(k_iter), D_HIDDEN, D_HIDDEN)
                        for _ in range(N_BLOCKS)])
    else:
        w1 = jnp.zeros((N_BLOCKS, D_HIDDEN, D_HIDDEN), jnp.float32)
        for _ in range(N_BLOCKS):
            next(k_iter)
    b1 = jnp.zeros((N_BLOCKS, 1, D_HIDDEN), jnp.float32)

    # lin_out: Linear(d_hidden, d_out), kaiming fan_in, bias 0
    w_out = kaiming_normal(next(k_iter), D_HIDDEN, D_OUT)
    b_out = jnp.zeros((1, D_OUT), jnp.float32)

    return (w_in, b_in, wz, bz, w0, b0, w1, b1, w_out, b_out)


# ----------------------------- pure-JAX reference ------------------------------
def resnetfc_reference(zx, params):
    """Unfused reference with the same bf16-operand / f32-accumulation contract."""
    (w_in, b_in, wz, bz, w0, b0, w1, b1, w_out, b_out) = params
    bf16, f32 = jnp.bfloat16, jnp.float32
    zxb = zx.astype(bf16)
    z = zxb[..., :D_LATENT]
    x_in = zxb[..., D_LATENT:]
    x = jnp.dot(x_in, w_in.astype(bf16), preferred_element_type=f32) + b_in[0]
    for blk in range(N_BLOCKS):
        tz = jnp.dot(z, wz[blk].astype(bf16), preferred_element_type=f32) + bz[blk, 0]
        x = x + tz
        net = jnp.dot(jnp.maximum(x, 0.0).astype(bf16), w0[blk].astype(bf16),
                      preferred_element_type=f32) + b0[blk, 0]
        dx = jnp.dot(jnp.maximum(net, 0.0).astype(bf16), w1[blk].astype(bf16),
                     preferred_element_type=f32) + b1[blk, 0]
        x = x + dx
    return jnp.dot(jnp.maximum(x, 0.0).astype(bf16), w_out.astype(bf16),
                   preferred_element_type=f32) + b_out[0]


# ----------------------------------- main --------------------------------------
if __name__ == "__main__":
    key = jax.random.PRNGKey(0)
    k_param, k_param2, k_zx = jax.random.split(key, 3)

    # zx: (B, S, d_latent + d_in) -> flattens to (128, 48) inside the wrapper
    B, S = 2, 64
    zx = jax.random.normal(k_zx, (B, S, D_ZX), dtype=jnp.float32)

    # 1) faithful init (fc_1 weights are zero, as in the PyTorch module)
    params = init_params(k_param, random_fc1=False)
    out = jax.block_until_ready(resnetfc_forward(zx, params))
    ref = resnetfc_reference(zx, params)
    assert out.shape == (B, S, D_OUT)
    assert jnp.allclose(out, ref, atol=2e-2, rtol=2e-2), "mismatch vs JAX reference"

    # 2) test-only variant with random fc_1 weights so that path is exercised
    params2 = init_params(k_param2, random_fc1=True)
    out2 = jax.block_until_ready(resnetfc_forward(zx, params2))
    ref2 = resnetfc_reference(zx, params2)
    assert jnp.allclose(out2, ref2, atol=2e-2, rtol=2e-2), "mismatch (random fc_1)"

    # 3) awkward batch size: exercises balanced-tile selection + padding path
    zx3 = jax.random.normal(k_zx, (3, 47, D_ZX), dtype=jnp.float32)
    out3 = jax.block_until_ready(resnetfc_forward(zx3, params2))
    ref3 = resnetfc_reference(zx3, params2)
    assert out3.shape == (3, 47, D_OUT)
    assert jnp.allclose(out3, ref3, atol=2e-2, rtol=2e-2), "mismatch (padded rows)"

    print("KERNEL_OK")
</pallas_src>

<mosaic_0001>
module attributes {stable_mosaic.version = 11 : i64} {
  func.func @resnetfc_kernel(%arg0: i32, %arg1: memref<64x48xbf16, #tpu.memory_space<vmem>>, %arg2: memref<48x128xbf16, #tpu.memory_space<vmem>>, %arg3: memref<1x128xf32, #tpu.memory_space<vmem>>, %arg4: memref<5x128x128xbf16, #tpu.memory_space<vmem>>, %arg5: memref<5x1x128xf32, #tpu.memory_space<vmem>>, %arg6: memref<4x176x128xbf16, #tpu.memory_space<vmem>>, %arg7: memref<4x1x128xf32, #tpu.memory_space<vmem>>, %arg8: memref<128x128xbf16, #tpu.memory_space<vmem>>, %arg9: memref<1x128xf32, #tpu.memory_space<vmem>>, %arg10: memref<128x4xbf16, #tpu.memory_space<vmem>>, %arg11: memref<1x4xf32, #tpu.memory_space<vmem>>, %arg12: memref<64x4xf32, #tpu.memory_space<vmem>>) attributes {dimension_semantics = [#tpu.dimension_semantics<parallel>], iteration_bounds = array<i64: 2>, scalar_prefetch = 0 : i64, scratch_operands = 0 : i64, tpu.core_type = #tpu.core_type<tc>, window_params = [{transform_indices = @transform_0, window_bounds = array<i64: 64, 48>}, {pipeline_mode = #tpu.pipeline_mode<synchronous>, transform_indices = @transform_1, window_bounds = array<i64: 48, 128>}, {pipeline_mode = #tpu.pipeline_mode<synchronous>, transform_indices = @transform_2, window_bounds = array<i64: 1, 128>}, {pipeline_mode = #tpu.pipeline_mode<synchronous>, transform_indices = @transform_3, window_bounds = array<i64: 5, 128, 128>}, {pipeline_mode = #tpu.pipeline_mode<synchronous>, transform_indices = @transform_4, window_bounds = array<i64: 5, 1, 128>}, {pipeline_mode = #tpu.pipeline_mode<synchronous>, transform_indices = @transform_5, window_bounds = array<i64: 4, 176, 128>}, {pipeline_mode = #tpu.pipeline_mode<synchronous>, transform_indices = @transform_6, window_bounds = array<i64: 4, 1, 128>}, {pipeline_mode = #tpu.pipeline_mode<synchronous>, transform_indices = @transform_7, window_bounds = array<i64: 128, 128>}, {pipeline_mode = #tpu.pipeline_mode<synchronous>, transform_indices = @transform_8, window_bounds = array<i64: 1, 128>}, {pipeline_mode = #tpu.pipeline_mode<synchronous>, transform_indices = @transform_9, window_bounds = array<i64: 128, 4>}, {pipeline_mode = #tpu.pipeline_mode<synchronous>, transform_indices = @transform_10, window_bounds = array<i64: 1, 4>}, {transform_indices = @transform_11, window_bounds = array<i64: 64, 4>}]} {
    %c0 = arith.constant 0 : index
    %c0_0 = arith.constant 0 : index
    %0 = vector.load %arg1[%c0, %c0_0] : memref<64x48xbf16, #tpu.memory_space<vmem>>, vector<64x48xbf16>
    %c0_1 = arith.constant 0 : index
    %c0_2 = arith.constant 0 : index
    %1 = vector.load %arg2[%c0_1, %c0_2] : memref<48x128xbf16, #tpu.memory_space<vmem>>, vector<48x128xbf16>
    %cst = arith.constant dense<0.000000e+00> : vector<64x128xf32>
    %2 = tpu.matmul %0, %1, %cst {dimension_numbers = #tpu.dot_dimension_numbers<[1], [0], [0], [1], [0, 0, 1, 1], [], []>} : vector<64x48xbf16>, vector<48x128xbf16>, vector<64x128xf32> -> vector<64x128xf32>
    %c0_3 = arith.constant 0 : index
    %c0_4 = arith.constant 0 : index
    %3 = vector.load %arg3[%c0_3, %c0_4] : memref<1x128xf32, #tpu.memory_space<vmem>>, vector<1x128xf32>
    %4 = vector.broadcast %3 : vector<1x128xf32> to vector<64x128xf32>
    %5 = arith.addf %2, %4 : vector<64x128xf32>
    %cst_5 = arith.constant 0.000000e+00 : f32
    %6 = vector.broadcast %cst_5 : f32 to vector<64x128xf32>
    %7 = arith.maximumf %5, %6 : vector<64x128xf32>
    %8 = arith.truncf %7 : vector<64x128xf32> to vector<64x128xbf16>
    %c0_6 = arith.constant 0 : index
    %c0_7 = arith.constant 0 : index
    %c0_8 = arith.constant 0 : index
    %9 = vector.load %arg4[%c0_6, %c0_7, %c0_8] : memref<5x128x128xbf16, #tpu.memory_space<vmem>>, vector<1x128x128xbf16>
    %10 = vector.shape_cast %9 : vector<1x128x128xbf16> to vector<128x128xbf16>
    %cst_9 = arith.constant dense<0.000000e+00> : vector<64x128xf32>
    %11 = tpu.matmul %8, %10, %cst_9 {dimension_numbers = #tpu.dot_dimension_numbers<[1], [0], [0], [1], [0, 0, 1, 1], [], []>} : vector<64x128xbf16>, vector<128x128xbf16>, vector<64x128xf32> -> vector<64x128xf32>
    %c0_10 = arith.constant 0 : index
    %c0_11 = arith.constant 0 : index
    %c0_12 = arith.constant 0 : index
    %12 = vector.load %arg5[%c0_10, %c0_11, %c0_12] : memref<5x1x128xf32, #tpu.memory_space<vmem>>, vector<1x1x128xf32>
    %13 = vector.shape_cast %12 : vector<1x1x128xf32> to vector<1x128xf32>
    %14 = vector.broadcast %13 : vector<1x128xf32> to vector<64x128xf32>
    %15 = arith.addf %11, %14 : vector<64x128xf32>
    %cst_13 = arith.constant 0.000000e+00 : f32
    %16 = vector.broadcast %cst_13 : f32 to vector<64x128xf32>
    %17 = arith.maximumf %15, %16 : vector<64x128xf32>
    %18 = arith.truncf %17 : vector<64x128xf32> to vector<64x128xbf16>
    %19 = tpu.concatenate %18, %0 in 1 : vector<64x128xbf16>, vector<64x48xbf16> -> vector<64x176xbf16>
    %c0_14 = arith.constant 0 : index
    %c0_15 = arith.constant 0 : index
    %c0_16 = arith.constant 0 : index
    %20 = vector.load %arg6[%c0_14, %c0_15, %c0_16] : memref<4x176x128xbf16, #tpu.memory_space<vmem>>, vector<1x176x128xbf16>
    %21 = vector.shape_cast %20 : vector<1x176x128xbf16> to vector<176x128xbf16>
    %cst_17 = arith.constant dense<0.000000e+00> : vector<64x128xf32>
    %22 = tpu.matmul %19, %21, %cst_17 {dimension_numbers = #tpu.dot_dimension_numbers<[1], [0], [0], [1], [0, 0, 1, 1], [], []>} : vector<64x176xbf16>, vector<176x128xbf16>, vector<64x128xf32> -> vector<64x128xf32>
    %c0_18 = arith.constant 0 : index
    %c0_19 = arith.constant 0 : index
    %c0_20 = arith.constant 0 : index
    %23 = vector.load %arg7[%c0_18, %c0_19, %c0_20] : memref<4x1x128xf32, #tpu.memory_space<vmem>>, vector<1x1x128xf32>
    %24 = vector.shape_cast %23 : vector<1x1x128xf32> to vector<1x128xf32>
    %25 = vector.broadcast %24 : vector<1x128xf32> to vector<64x128xf32>
    %26 = arith.addf %22, %25 : vector<64x128xf32>
    %27 = arith.addf %5, %26 : vector<64x128xf32>
    %cst_21 = arith.constant 0.000000e+00 : f32
    %28 = vector.broadcast %cst_21 : f32 to vector<64x128xf32>
    %29 = arith.maximumf %27, %28 : vector<64x128xf32>
    %30 = arith.truncf %29 : vector<64x128xf32> to vector<64x128xbf16>
    %c1 = arith.constant 1 : index
    %c0_22 = arith.constant 0 : index
    %c0_23 = arith.constant 0 : index
    %31 = vector.load %arg4[%c1, %c0_22, %c0_23] : memref<5x128x128xbf16, #tpu.memory_space<vmem>>, vector<1x128x128xbf16>
    %32 = vector.shape_cast %31 : vector<1x128x128xbf16> to vector<128x128xbf16>
    %cst_24 = arith.constant dense<0.000000e+00> : vector<64x128xf32>
    %33 = tpu.matmul %30, %32, %cst_24 {dimension_numbers = #tpu.dot_dimension_numbers<[1], [0], [0], [1], [0, 0, 1, 1], [], []>} : vector<64x128xbf16>, vector<128x128xbf16>, vector<64x128xf32> -> vector<64x128xf32>
    %c1_25 = arith.constant 1 : index
    %c0_26 = arith.constant 0 : index
    %c0_27 = arith.constant 0 : index
    %34 = vector.load %arg5[%c1_25, %c0_26, %c0_27] : memref<5x1x128xf32, #tpu.memory_space<vmem>>, vector<1x1x128xf32>
    %35 = vector.shape_cast %34 : vector<1x1x128xf32> to vector<1x128xf32>
    %36 = vector.broadcast %35 : vector<1x128xf32> to vector<64x128xf32>
    %37 = arith.addf %33, %36 : vector<64x128xf32>
    %cst_28 = arith.constant 0.000000e+00 : f32
    %38 = vector.broadcast %cst_28 : f32 to vector<64x128xf32>
    %39 = arith.maximumf %37, %38 : vector<64x128xf32>
    %40 = arith.truncf %39 : vector<64x128xf32> to vector<64x128xbf16>
    %41 = tpu.concatenate %40, %0 in 1 : vector<64x128xbf16>, vector<64x48xbf16> -> vector<64x176xbf16>
    %c1_29 = arith.constant 1 : index
    %c0_30 = arith.constant 0 : index
    %c0_31 = arith.constant 0 : index
    %42 = vector.load %arg6[%c1_29, %c0_30, %c0_31] : memref<4x176x128xbf16, #tpu.memory_space<vmem>>, vector<1x176x128xbf16>
    %43 = vector.shape_cast %42 : vector<1x176x128xbf16> to vector<176x128xbf16>
    %cst_32 = arith.constant dense<0.000000e+00> : vector<64x128xf32>
    %44 = tpu.matmul %41, %43, %cst_32 {dimension_numbers = #tpu.dot_dimension_numbers<[1], [0], [0], [1], [0, 0, 1, 1], [], []>} : vector<64x176xbf16>, vector<176x128xbf16>, vector<64x128xf32> -> vector<64x128xf32>
    %c1_33 = arith.constant 1 : index
    %c0_34 = arith.constant 0 : index
    %c0_35 = arith.constant 0 : index
    %45 = vector.load %arg7[%c1_33, %c0_34, %c0_35] : memref<4x1x128xf32, #tpu.memory_space<vmem>>, vector<1x1x128xf32>
    %46 = vector.shape_cast %45 : vector<1x1x128xf32> to vector<1x128xf32>
    %47 = vector.broadcast %46 : vector<1x128xf32> to vector<64x128xf32>
    %48 = arith.addf %44, %47 : vector<64x128xf32>
    %49 = arith.addf %27, %48 : vector<64x128xf32>
    %cst_36 = arith.constant 0.000000e+00 : f32
    %50 = vector.broadcast %cst_36 : f32 to vector<64x128xf32>
    %51 = arith.maximumf %49, %50 : vector<64x128xf32>
    %52 = arith.truncf %51 : vector<64x128xf32> to vector<64x128xbf16>
    %c2 = arith.constant 2 : index
    %c0_37 = arith.constant 0 : index
    %c0_38 = arith.constant 0 : index
    %53 = vector.load %arg4[%c2, %c0_37, %c0_38] : memref<5x128x128xbf16, #tpu.memory_space<vmem>>, vector<1x128x128xbf16>
    %54 = vector.shape_cast %53 : vector<1x128x128xbf16> to vector<128x128xbf16>
    %cst_39 = arith.constant dense<0.000000e+00> : vector<64x128xf32>
    %55 = tpu.matmul %52, %54, %cst_39 {dimension_numbers = #tpu.dot_dimension_numbers<[1], [0], [0], [1], [0, 0, 1, 1], [], []>} : vector<64x128xbf16>, vector<128x128xbf16>, vector<64x128xf32> -> vector<64x128xf32>
    %c2_40 = arith.constant 2 : index
    %c0_41 = arith.constant 0 : index
    %c0_42 = arith.constant 0 : index
    %56 = vector.load %arg5[%c2_40, %c0_41, %c0_42] : memref<5x1x128xf32, #tpu.memory_space<vmem>>, vector<1x1x128xf32>
    %57 = vector.shape_cast %56 : vector<1x1x128xf32> to vector<1x128xf32>
    %58 = vector.broadcast %57 : vector<1x128xf32> to vector<64x128xf32>
    %59 = arith.addf %55, %58 : vector<64x128xf32>
    %cst_43 = arith.constant 0.000000e+00 : f32
    %60 = vector.broadcast %cst_43 : f32 to vector<64x128xf32>
    %61 = arith.maximumf %59, %60 : vector<64x128xf32>
    %62 = arith.truncf %61 : vector<64x128xf32> to vector<64x128xbf16>
    %63 = tpu.concatenate %62, %0 in 1 : vector<64x128xbf16>, vector<64x48xbf16> -> vector<64x176xbf16>
    %c2_44 = arith.constant 2 : index
    %c0_45 = arith.constant 0 : index
    %c0_46 = arith.constant 0 : index
    %64 = vector.load %arg6[%c2_44, %c0_45, %c0_46] : memref<4x176x128xbf16, #tpu.memory_space<vmem>>, vector<1x176x128xbf16>
    %65 = vector.shape_cast %64 : vector<1x176x128xbf16> to vector<176x128xbf16>
    %cst_47 = arith.constant dense<0.000000e+00> : vector<64x128xf32>
    %66 = tpu.matmul %63, %65, %cst_47 {dimension_numbers = #tpu.dot_dimension_numbers<[1], [0], [0], [1], [0, 0, 1, 1], [], []>} : vector<64x176xbf16>, vector<176x128xbf16>, vector<64x128xf32> -> vector<64x128xf32>
    %c2_48 = arith.constant 2 : index
    %c0_49 = arith.constant 0 : index
    %c0_50 = arith.constant 0 : index
    %67 = vector.load %arg7[%c2_48, %c0_49, %c0_50] : memref<4x1x128xf32, #tpu.memory_space<vmem>>, vector<1x1x128xf32>
    %68 = vector.shape_cast %67 : vector<1x1x128xf32> to vector<1x128xf32>
    %69 = vector.broadcast %68 : vector<1x128xf32> to vector<64x128xf32>
    %70 = arith.addf %66, %69 : vector<64x128xf32>
    %71 = arith.addf %49, %70 : vector<64x128xf32>
    %cst_51 = arith.constant 0.000000e+00 : f32
    %72 = vector.broadcast %cst_51 : f32 to vector<64x128xf32>
    %73 = arith.maximumf %71, %72 : vector<64x128xf32>
    %74 = arith.truncf %73 : vector<64x128xf32> to vector<64x128xbf16>
    %c3 = arith.constant 3 : index
    %c0_52 = arith.constant 0 : index
    %c0_53 = arith.constant 0 : index
    %75 = vector.load %arg4[%c3, %c0_52, %c0_53] : memref<5x128x128xbf16, #tpu.memory_space<vmem>>, vector<1x128x128xbf16>
    %76 = vector.shape_cast %75 : vector<1x128x128xbf16> to vector<128x128xbf16>
    %cst_54 = arith.constant dense<0.000000e+00> : vector<64x128xf32>
    %77 = tpu.matmul %74, %76, %cst_54 {dimension_numbers = #tpu.dot_dimension_numbers<[1], [0], [0], [1], [0, 0, 1, 1], [], []>} : vector<64x128xbf16>, vector<128x128xbf16>, vector<64x128xf32> -> vector<64x128xf32>
    %c3_55 = arith.constant 3 : index
    %c0_56 = arith.constant 0 : index
    %c0_57 = arith.constant 0 : index
    %78 = vector.load %arg5[%c3_55, %c0_56, %c0_57] : memref<5x1x128xf32, #tpu.memory_space<vmem>>, vector<1x1x128xf32>
    %79 = vector.shape_cast %78 : vector<1x1x128xf32> to vector<1x128xf32>
    %80 = vector.broadcast %79 : vector<1x128xf32> to vector<64x128xf32>
    %81 = arith.addf %77, %80 : vector<64x128xf32>
    %cst_58 = arith.constant 0.000000e+00 : f32
    %82 = vector.broadcast %cst_58 : f32 to vector<64x128xf32>
    %83 = arith.maximumf %81, %82 : vector<64x128xf32>
    %84 = arith.truncf %83 : vector<64x128xf32> to vector<64x128xbf16>
    %85 = tpu.concatenate %84, %0 in 1 : vector<64x128xbf16>, vector<64x48xbf16> -> vector<64x176xbf16>
    %c3_59 = arith.constant 3 : index
    %c0_60 = arith.constant 0 : index
    %c0_61 = arith.constant 0 : index
    %86 = vector.load %arg6[%c3_59, %c0_60, %c0_61] : memref<4x176x128xbf16, #tpu.memory_space<vmem>>, vector<1x176x128xbf16>
    %87 = vector.shape_cast %86 : vector<1x176x128xbf16> to vector<176x128xbf16>
    %cst_62 = arith.constant dense<0.000000e+00> : vector<64x128xf32>
    %88 = tpu.matmul %85, %87, %cst_62 {dimension_numbers = #tpu.dot_dimension_numbers<[1], [0], [0], [1], [0, 0, 1, 1], [], []>} : vector<64x176xbf16>, vector<176x128xbf16>, vector<64x128xf32> -> vector<64x128xf32>
    %c3_63 = arith.constant 3 : index
    %c0_64 = arith.constant 0 : index
    %c0_65 = arith.constant 0 : index
    %89 = vector.load %arg7[%c3_63, %c0_64, %c0_65] : memref<4x1x128xf32, #tpu.memory_space<vmem>>, vector<1x1x128xf32>
    %90 = vector.shape_cast %89 : vector<1x1x128xf32> to vector<1x128xf32>
    %91 = vector.broadcast %90 : vector<1x128xf32> to vector<64x128xf32>
    %92 = arith.addf %88, %91 : vector<64x128xf32>
    %93 = arith.addf %71, %92 : vector<64x128xf32>
    %cst_66 = arith.constant 0.000000e+00 : f32
    %94 = vector.broadcast %cst_66 : f32 to vector<64x128xf32>
    %95 = arith.maximumf %93, %94 : vector<64x128xf32>
    %96 = arith.truncf %95 : vector<64x128xf32> to vector<64x128xbf16>
    %c4 = arith.constant 4 : index
    %c0_67 = arith.constant 0 : index
    %c0_68 = arith.constant 0 : index
    %97 = vector.load %arg4[%c4, %c0_67, %c0_68] : memref<5x128x128xbf16, #tpu.memory_space<vmem>>, vector<1x128x128xbf16>
    %98 = vector.shape_cast %97 : vector<1x128x128xbf16> to vector<128x128xbf16>
    %cst_69 = arith.constant dense<0.000000e+00> : vector<64x128xf32>
    %99 = tpu.matmul %96, %98, %cst_69 {dimension_numbers = #tpu.dot_dimension_numbers<[1], [0], [0], [1], [0, 0, 1, 1], [], []>} : vector<64x128xbf16>, vector<128x128xbf16>, vector<64x128xf32> -> vector<64x128xf32>
    %c4_70 = arith.constant 4 : index
    %c0_71 = arith.constant 0 : index
    %c0_72 = arith.constant 0 : index
    %100 = vector.load %arg5[%c4_70, %c0_71, %c0_72] : memref<5x1x128xf32, #tpu.memory_space<vmem>>, vector<1x1x128xf32>
    %101 = vector.shape_cast %100 : vector<1x1x128xf32> to vector<1x128xf32>
    %102 = vector.broadcast %101 : vector<1x128xf32> to vector<64x128xf32>
    %103 = arith.addf %99, %102 : vector<64x128xf32>
    %cst_73 = arith.constant 0.000000e+00 : f32
    %104 = vector.broadcast %cst_73 : f32 to vector<64x128xf32>
    %105 = arith.maximumf %103, %104 : vector<64x128xf32>
    %106 = arith.truncf %105 : vector<64x128xf32> to vector<64x128xbf16>
    %c0_74 = arith.constant 0 : index
    %c0_75 = arith.constant 0 : index
    %107 = vector.load %arg8[%c0_74, %c0_75] : memref<128x128xbf16, #tpu.memory_space<vmem>>, vector<128x128xbf16>
    %cst_76 = arith.constant dense<0.000000e+00> : vector<64x128xf32>
    %108 = tpu.matmul %106, %107, %cst_76 {dimension_numbers = #tpu.dot_dimension_numbers<[1], [0], [0], [1], [0, 0, 1, 1], [], []>} : vector<64x128xbf16>, vector<128x128xbf16>, vector<64x128xf32> -> vector<64x128xf32>
    %c0_77 = arith.constant 0 : index
    %c0_78 = arith.constant 0 : index
    %109 = vector.load %arg9[%c0_77, %c0_78] : memref<1x128xf32, #tpu.memory_space<vmem>>, vector<1x128xf32>
    %110 = vector.broadcast %109 : vector<1x128xf32> to vector<64x128xf32>
    %111 = arith.addf %108, %110 : vector<64x128xf32>
    %112 = arith.addf %93, %111 : vector<64x128xf32>
    %cst_79 = arith.constant 0.000000e+00 : f32
    %113 = vector.broadcast %cst_79 : f32 to vector<64x128xf32>
    %114 = arith.maximumf %112, %113 : vector<64x128xf32>
    %115 = arith.truncf %114 : vector<64x128xf32> to vector<64x128xbf16>
    %c0_80 = arith.constant 0 : index
    %c0_81 = arith.constant 0 : index
    %116 = vector.load %arg10[%c0_80, %c0_81] : memref<128x4xbf16, #tpu.memory_space<vmem>>, vector<128x4xbf16>
    %cst_82 = arith.constant dense<0.000000e+00> : vector<64x4xf32>
    %117 = tpu.matmul %115, %116, %cst_82 {dimension_numbers = #tpu.dot_dimension_numbers<[1], [0], [0], [1], [0, 0, 1, 1], [], []>} : vector<64x128xbf16>, vector<128x4xbf16>, vector<64x4xf32> -> vector<64x4xf32>
    %c0_83 = arith.constant 0 : index
    %c0_84 = arith.constant 0 : index
    %118 = vector.load %arg11[%c0_83, %c0_84] : memref<1x4xf32, #tpu.memory_space<vmem>>, vector<1x4xf32>
    %119 = vector.broadcast %118 : vector<1x4xf32> to vector<64x4xf32>
    %120 = arith.addf %117, %119 : vector<64x4xf32>
    %c0_85 = arith.constant 0 : index
    %c0_86 = arith.constant 0 : index
    %121 = vector.load %arg12[%c0_85, %c0_86] : memref<64x4xf32, #tpu.memory_space<vmem>>, vector<64x4xf32>
    tpu.vector_store %arg12[%c0_85, %c0_86], %120 {strides = array<i32>} : memref<64x4xf32, #tpu.memory_space<vmem>>, vector<64x4xf32>,
    return
  }
  func.func @transform_0(%arg0: i32) -> (i32, i32) {
    %c0_i32 = arith.constant 0 : i32
    %c0_i32_0 = arith.constant 0 : i32
    return %arg0, %c0_i32 : i32, i32
  }
  func.func @transform_1(%arg0: i32) -> (i32, i32) {
    %c0_i32 = arith.constant 0 : i32
    %c0_i32_0 = arith.constant 0 : i32
    %c0_i32_1 = arith.constant 0 : i32
    return %c0_i32, %c0_i32_0 : i32, i32
  }
  func.func @transform_2(%arg0: i32) -> (i32, i32) {
    %c0_i32 = arith.constant 0 : i32
    %c0_i32_0 = arith.constant 0 : i32
    %c0_i32_1 = arith.constant 0 : i32
    return %c0_i32, %c0_i32_0 : i32, i32
  }
  func.func @transform_3(%arg0: i32) -> (i32, i32, i32) {
    %c0_i32 = arith.constant 0 : i32
    %c0_i32_0 = arith.constant 0 : i32
    %c0_i32_1 = arith.constant 0 : i32
    %c0_i32_2 = arith.constant 0 : i32
    return %c0_i32, %c0_i32_0, %c0_i32_1 : i32, i32, i32
  }
  func.func @transform_4(%arg0: i32) -> (i32, i32, i32) {
    %c0_i32 = arith.constant 0 : i32
    %c0_i32_0 = arith.constant 0 : i32
    %c0_i32_1 = arith.constant 0 : i32
    %c0_i32_2 = arith.constant 0 : i32
    return %c0_i32, %c0_i32_0, %c0_i32_1 : i32, i32, i32
  }
  func.func @transform_5(%arg0: i32) -> (i32, i32, i32) {
    %c0_i32 = arith.constant 0 : i32
    %c0_i32_0 = arith.constant 0 : i32
    %c0_i32_1 = arith.constant 0 : i32
    %c0_i32_2 = arith.constant 0 : i32
    return %c0_i32, %c0_i32_0, %c0_i32_1 : i32, i32, i32
  }
  func.func @transform_6(%arg0: i32) -> (i32, i32, i32) {
    %c0_i32 = arith.constant 0 : i32
    %c0_i32_0 = arith.constant 0 : i32
    %c0_i32_1 = arith.constant 0 : i32
    %c0_i32_2 = arith.constant 0 : i32
    return %c0_i32, %c0_i32_0, %c0_i32_1 : i32, i32, i32
  }
  func.func @transform_7(%arg0: i32) -> (i32, i32) {
    %c0_i32 = arith.constant 0 : i32
    %c0_i32_0 = arith.constant 0 : i32
    %c0_i32_1 = arith.constant 0 : i32
    return %c0_i32, %c0_i32_0 : i32, i32
  }
  func.func @transform_8(%arg0: i32) -> (i32, i32) {
    %c0_i32 = arith.constant 0 : i32
    %c0_i32_0 = arith.constant 0 : i32
    %c0_i32_1 = arith.constant 0 : i32
    return %c0_i32, %c0_i32_0 : i32, i32
  }
  func.func @transform_9(%arg0: i32) -> (i32, i32) {
    %c0_i32 = arith.constant 0 : i32
    %c0_i32_0 = arith.constant 0 : i32
    %c0_i32_1 = arith.constant 0 : i32
    return %c0_i32, %c0_i32_0 : i32, i32
  }
  func.func @transform_10(%arg0: i32) -> (i32, i32) {
    %c0_i32 = arith.constant 0 : i32
    %c0_i32_0 = arith.constant 0 : i32
    %c0_i32_1 = arith.constant 0 : i32
    return %c0_i32, %c0_i32_0 : i32, i32
  }
  func.func @transform_11(%arg0: i32) -> (i32, i32) {
    %c0_i32 = arith.constant 0 : i32
    %c0_i32_0 = arith.constant 0 : i32
    return %arg0, %c0_i32 : i32, i32
  }
}

</mosaic_0001>

<bundles_post_ra>
// kernel: resnetfc_forward.1
= control target key start
LH: loop header
LB: loop body
LE: loop exit
PB: predicated region body
PF: predicated region fallthrough
CT: control target
= control target key end

     0   :  { %s3120_s17 = smov 0   ;;  %s3764_s0 = inlined_call_operand.vmem [shape: bf16[128,48], index: 0, kind: input, shape index: {}]   ;;  %s3765_s1 = inlined_call_operand.vmem [shape: bf16[48,128], index: 1, kind: input, shape index: {}]   ;;  %s3766_s2 = inlined_call_operand.vmem [shape: f32[1,128], index: 2, kind: input, shape index: {}]   ;;  %s3767_s3 = inlined_call_operand.vmem [shape: bf16[5,128,128], index: 3, kind: input, shape index: {}]   ;;  %s3768_s4 = inlined_call_operand.vmem [shape: f32[5,1,128], index: 4, kind: input, shape index: {}]   ;;  %s3769_s5 = inlined_call_operand.vmem [shape: bf16[4,176,128], index: 5, kind: input, shape index: {}]   ;;  %s3770_s6 = inlined_call_operand.vmem [shape: f32[4,1,128], index: 6, kind: input, shape index: {}]   ;;  %s3771_s7 = inlined_call_operand.vmem [shape: bf16[128,128], index: 7, kind: input, shape index: {}]   ;;  %s3772_s8 = inlined_call_operand.vmem [shape: f32[1,128], index: 8, kind: input, shape index: {}]   ;;  %s3773_s9 = inlined_call_operand.vmem [shape: bf16[128,4], index: 9, kind: input, shape index: {}]   ;;  %s3774_s10 = inlined_call_operand.vmem [shape: f32[1,4], index: 10, kind: input, shape index: {}]   ;;  %s3775_s11 = inlined_call_operand.vmem [shape: f32[128,4], index: 11, kind: output, shape index: {}]  }
   0x1 LB: > { %s2371_s18 = sadd.s32 4294967295, %s3057_s17   ;;  %p2375_p0 = scmp.ge.s32.totalorder %s3057_s17, 1  ;;  %s3057_s17 = sphi %s3120_s17, %s21_s17  }
   0x2   : > { %p338_p1 = scmp.lt.s32.totalorder %s3057_s17, 3 }
   0x4   : > { %p339_p2 = pnand %p2375_p0, %p338_p1 }
   0x5   : > { %v2940_v0 = vld [vmem:[%s3765_s1] sm:$0xff] (!%p339_p2)   ;;  %s2376_s21 = sshll.u32 (!%p339_p2), %s2371_s18, 3  ;;  %v2941_v1 = vld [vmem:[%s3765_s1 + $0x8] sm:$0xff] (!%p339_p2)   ;;  %v2942_v2 = vld [vmem:[%s3765_s1 + $0x10] sm:$0xff] (!%p339_p2)   ;;  %vm450_vm0 = vcmask (!%p339_p2), 392192   ;;  %v3059_v16 = vmov (!%p339_p2), 0  }
   0x6   : > { %342 = sbr.rel (%p339_p2) target bundleno = 2724 (0xaa4), region = 64  ;;  %p379_p3 = scmp.lt.s32.totalorder (!%p339_p2), %s2376_s21, 15  ;;  %2749 = vmatprep.subr.bf16.mxu0 (!%p339_p2), %v2940_v0  ;;  %v2947_v3 = vld [vmem:[%s3767_s3] sm:$0xff] (!%p339_p2)   ;;  %v2948_v4 = vld [vmem:[%s3767_s3 + $0x8] sm:$0xff] (!%p339_p2)   ;;  %v2949_v5 = vld [vmem:[%s3767_s3 + $0x10] sm:$0xff] (!%p339_p2)   ;;  %vm2306_vm1 = vcmask (!%p339_p2), 31744  }
   0x7   : > { %2750 = vmatpush3.bf16.msra.mxu0 (!%p339_p2), %v2940_v0  ;;  %2763 = vmatprep.subr.bf16.mxu1 (!%p339_p2), %v2947_v3  ;;  %v2950_v7 = vld [vmem:[%s3767_s3 + $0x18] sm:$0xff] (!%p339_p2)   ;;  %v2951_v10 = vld [vmem:[%s3767_s3 + $0x20] sm:$0xff] (!%p339_p2)   ;;  %v2952_v12 = vld [vmem:[%s3767_s3 + $0x28] sm:$0xff] (!%p339_p2)  }
   0x8   : > { %2751 = vmatprep.subr.bf16.mxu0 (!%p339_p2), %v2941_v1  ;;  %2764 = vmatpush3.bf16.msra.mxu1 (!%p339_p2), %v2947_v3  ;;  %v2953_v13 = vld [vmem:[%s3767_s3 + $0x30] sm:$0xff] (!%p339_p2)   ;;  %v2954_v14 = vld [vmem:[%s3767_s3 + $0x38] sm:$0xff] (!%p339_p2)   ;;  %v2955_v15 = vld [vmem:[%s3769_s5] sm:$0xff] (!%p339_p2)  }
   0x9   : > { %2765 = vmatprep.subr.bf16.mxu1 (!%p339_p2), %v2948_v4  ;;  %v2956_v17 = vld [vmem:[%s3769_s5 + $0x8] sm:$0xff] (!%p339_p2)   ;;  %v2957_v18 = vld [vmem:[%s3769_s5 + $0x10] sm:$0xff] (!%p339_p2)   ;;  %v2958_v19 = vld [vmem:[%s3769_s5 + $0x18] sm:$0xff] (!%p339_p2)  }
   0xa   : > { %v2959_v20 = vld [vmem:[%s3769_s5 + $0x20] sm:$0xff] (!%p339_p2)   ;;  %v2960_v21 = vld [vmem:[%s3769_s5 + $0x28] sm:$0xff] (!%p339_p2)   ;;  %v2961_v22 = vld [vmem:[%s3769_s5 + $0x30] sm:$0xff] (!%p339_p2)  }
   0xb   : > { %2752 = vmatpush3.bf16.msra.mxu0 (!%p339_p2), %v2941_v1  ;;  %v2962_v23 = vld [vmem:[%s3769_s5 + $0x38] sm:$0xff] (!%p339_p2)   ;;  %v2963_v24 = vld [vmem:[%s3769_s5 + $0x40] sm:$0xff] (!%p339_p2)   ;;  %v2964_v54 = vld [vmem:[%s3769_s5 + $0x48] sm:$0xff] (!%p339_p2)  }
   0xc   : > { %2753 = vmatprep.subr.bf16.mxu0 (!%p339_p2), %v2942_v2  ;;  %2766 = vmatpush3.bf16.msra.mxu1 (!%p339_p2), %v2948_v4  ;;  %v2380_v25 = vld [vmem:[%s3766_s2] ss:$0 sm:$0xff] (!%p339_p2)  ;;  %v2965_v55 = vld [vmem:[%s3769_s5 + $0x50] sm:$0xff] (!%p339_p2)   ;;  %v2967_v57 = vld [vmem:[%s3767_s3 + $0x48] sm:$0xff] (!%p339_p2)  }
   0xd   : > { %s3777_s21 = smov (!%p379_p3, %s2376_s21), 15  ;;  %2767 = vmatprep.subr.bf16.mxu1 %v2949_v5  ;;  %v2966_v56 = vld [vmem:[%s3767_s3 + $0x40] sm:$0xff]   ;;  %v2968_v58 = vld [vmem:[%s3767_s3 + $0x50] sm:$0xff]   ;;  %v2969_v59 = vld [vmem:[%s3767_s3 + $0x58] sm:$0xff]  }
   0xe   : > { %s2377_s30 = sshll.u32 %s3777_s21, 2  ;;  %v2392_v60 = vld [vmem:[%s3768_s4] ss:$0 sm:$0xff]  ;;  %s2379_s22 = sshll.u32 %s3777_s21, 3 }
   0xf   : > { %s3149_s14 = scalar_lea.vmem %s3764_s0, %s2377_s30  ;;  %2754 = vmatpush3.bf16.msra.mxu0 %v2942_v2  ;;  %s388_s26 = scalar_lea.vmem %s3775_s11, %s2379_s22 }
  0x10   : > { %v3155_v6 = vld [vmem:[%s3149_s14] sm:$0xff]   ;;  %v3163_v8 = vld [vmem:[%s3149_s14 + $0x8] sm:$0xff]   ;;  %v3166_v9 = vld [vmem:[%s3149_s14 + $0x10] sm:$0xff]   ;;  %2768 = vmatpush3.bf16.msra.mxu1 %v2949_v5  ;;  %783 = vmatprep.subr.bf16.mxu0 %v3059_v16 }
  0x11   : > { %2755 = vmatprep.mubr.msk.bf16.mxu0 %vm450_vm0, %v3155_v6  ;;  %2769 = vmatprep.subr.bf16.mxu1 %v2950_v7  ;;  %v3176_v11 = vld [vmem:[%s3149_s14 + $0x18] sm:$0xff]  }
  0x12   : > { %2756 = vmatmul.mubr.msk.bf16.vlgmr.msra.gmra.mrb[0].mxu0 %vm450_vm0, %v3163_v8 }
  0x13   : > { %2759 = vmatprep.mubr.msk.bf16.mxu0 %vm450_vm0, %v3166_v9  ;;  %784 = vmatpush1.bf16.msra.mxu0 %v2955_v15 }
  0x14   : > { %2770 = vmatpush3.bf16.msra.mxu1 %v2950_v7  ;;  %785 = vmatprep.subr.bf16.mxu0 %v3059_v16 }
  0x15   : > { %2771 = vmatprep.subr.bf16.mxu1 %v2951_v10 }
  0x17   : > { %786 = vmatpush1.bf16.msra.mxu0 %v2956_v17 }
  0x18   : > { %2772 = vmatpush3.bf16.msra.mxu1 %v2951_v10  ;;  %787 = vmatprep.subr.bf16.mxu0 %v3059_v16 }
  0x19   : > { %2773 = vmatprep.subr.bf16.mxu1 %v2952_v12 }
  0x1a   : > { %2760 = vmatmul.mubr.msk.bf16.gmra.mrb[4].mxu0 %vm450_vm0, %v3176_v11 }
  0x1b   : > { %2413 = vmatprep.mubr.msk.bf16.mxu0 %vm450_vm0, %v3155_v6  ;;  %788 = vmatpush1.bf16.msra.mxu0 %v2957_v18 }
  0x1c   : > { %2774 = vmatpush3.bf16.msra.mxu1 %v2952_v12  ;;  %789 = vmatprep.subr.bf16.mxu0 %v3059_v16 }
  0x1d   : > { %2775 = vmatprep.subr.bf16.mxu1 %v2953_v13 }
  0x1f   : > { %790 = vmatpush1.bf16.msra.mxu0 %v2958_v19 }
  0x20   : > { %2776 = vmatpush3.bf16.msra.mxu1 %v2953_v13  ;;  %791 = vmatprep.subr.bf16.mxu0 %v3059_v16 }
  0x21   : > { %2777 = vmatprep.subr.bf16.mxu1 %v2954_v14 }
  0x23   : > { %792 = vmatpush1.bf16.msra.mxu0 %v2959_v20 }
  0x24   : > { %2778 = vmatpush3.bf16.msra.mxu1 %v2954_v14  ;;  %793 = vmatprep.subr.bf16.mxu0 %v3059_v16 }
  0x25   : > { %2787 = vmatprep.subr.bf16.mxu1 %v2966_v56 }
  0x27   : > { %794 = vmatpush1.bf16.msra.mxu0 %v2960_v21 }
  0x28   : > { %795 = vmatprep.subr.bf16.mxu0 %v3059_v16 }
  0x2b   : > { %796 = vmatpush1.bf16.msra.mxu0 %v2961_v22 }
  0x2c   : > { %797 = vmatprep.subr.bf16.mxu0 %v3059_v16 }
  0x2f   : > { %798 = vmatpush1.bf16.msra.mxu0 %v2962_v23 }
  0x30   : > { %799 = vmatprep.subr.bf16.mxu0 %v3059_v16 }
  0x33   : > { %800 = vmatpush1.bf16.msra.mxu0 %v2963_v24 }
  0x34   : > { %801 = vmatprep.subr.bf16.mxu0 %v3059_v16 }
  0x37   : > { %802 = vmatpush1.bf16.msra.mxu0 %v2964_v54 }
  0x38   : > { %803 = vmatprep.subr.bf16.mxu0 %v3059_v16 }
  0x3b   : > { %804 = vmatpush1.bf16.msra.mxu0 %v2965_v55 }
  0x3c   : > { %1115 = vmatprep.subr.bf16.mxu0 %v3059_v16 }
  0xe5   : > { %v2757_v26 = vpop.f32.mrb[0].mxu0 }
  0xe6   : > { %v497_v27 = vpop.f32.mrb[1].mxu0  ;;  %v3233_v30 = vadd.f32 %v2757_v26, %v2380_v25 }
  0xe7   : > { %v3231_v28 = vadd.f32 %v2380_v25, %v497_v27  ;;  %v2758_v29 = vpop.f32.mrb[2].mxu0 }
  0xe8   : > { %v3235_v31 = vadd.f32 %v2758_v29, %v2380_v25  ;;  %v500_v32 = vpop.f32.mrb[3].mxu0  ;;  %v530_v37 = vmax.f32 %v3233_v30, 0.0 }
  0xe9   : > { %v3237_v33 = vadd.f32 %v2380_v25, %v500_v32  ;;  %v528_v35 = vmax.f32 %v3231_v28, 0.0 }
  0xea   : > { %v531_v34 = vmax.f32 %v3235_v31, 0.0 }
  0xeb   : > { %v529_v36 = vmax.f32 %v3237_v33, 0.0 }
  0xec   : > { %v537_v42 = vpack.c.bf16 %v531_v34, %v530_v37  ;;  %v2970_v34 = vld [vmem:[%s3767_s3 + $0x60] sm:$0xff]   ;;  %v2974_v37 = vld [vmem:[%s3769_s5 + $0x58] sm:$0xff]  }
  0xed   : > { %v2761_v38 = vpop.f32.mrb[4].mxu0  ;;  %v536_v39 = vpack.c.bf16 %v529_v36, %v528_v35  ;;  %v2971_v35 = vld [vmem:[%s3767_s3 + $0x68] sm:$0xff]   ;;  %v2972_v36 = vld [vmem:[%s3767_s3 + $0x70] sm:$0xff]  }
  0xee   : > { %v3243_v40 = vadd.f32 %v2761_v38, %v2380_v25  ;;  %v513_v41 = vpop.f32.mrb[5].mxu0  ;;  %v2975_v38 = vld [vmem:[%s3769_s5 + $0x60] sm:$0xff]  }
  0xef   : > { %v3245_v43 = vadd.f32 %v2380_v25, %v513_v41  ;;  %2779 = vmatprep.mubr.bf16.mxu1 %v536_v39  ;;  %v2762_v44 = vpop.f32.mrb[6].mxu0  ;;  %v2976_v39 = vld [vmem:[%s3769_s5 + $0x68] sm:$0xff]   ;;  %v2977_v41 = vld [vmem:[%s3769_s5 + $0x70] sm:$0xff]  }
  0xf0   : > { %v534_v45 = vmax.f32 %v3243_v40, 0.0  ;;  %v3248_v46 = vadd.f32 %v2762_v44, %v2380_v25  ;;  %2780 = vmatmul.mubr.bf16.vlgmr.msra.gmra.mrb[0].mxu1 %v537_v42  ;;  %v516_v47 = vpop.f32.mrb[7].mxu0  ;;  %v2978_v42 = vld [vmem:[%s3769_s5 + $0x78] sm:$0xff]   ;;  %v2979_v44 = vld [vmem:[%s3769_s5 + $0x80] sm:$0xff]  }
  0xf1   : > { %v532_v48 = vmax.f32 %v3245_v43, 0.0  ;;  %v3251_v49 = vadd.f32 %v2380_v25, %v516_v47  ;;  %2788 = vmatpush3.bf16.msra.mxu1 %v2966_v56  ;;  %v2981_v47 = vld [vmem:[%s3769_s5 + $0x90] sm:$0xff]  }
  0xf2   : > { %v535_v50 = vmax.f32 %v3248_v46, 0.0  ;;  %2789 = vmatprep.subr.bf16.mxu1 %v2967_v57 }
  0xf3   : > { %v533_v51 = vmax.f32 %v3251_v49, 0.0 }
  0xf4   : > { %v539_v52 = vpack.c.bf16 %v535_v50, %v534_v45  ;;  %v2980_v45 = vld [vmem:[%s3769_s5 + $0x88] sm:$0xff]   ;;  %v2401_v50 = vld [vmem:[%s3770_s6] ss:$0 sm:$0xff] }
  0xf5   : > { %v538_v53 = vpack.c.bf16 %v533_v51, %v532_v48  ;;  %2790 = vmatpush3.bf16.msra.mxu1 %v2967_v57  ;;  %v2982_v48 = vld [vmem:[%s3769_s5 + $0x98] sm:$0xff]  }
  0xf6   : > { %2791 = vmatprep.subr.bf16.mxu1 %v2968_v58 }
  0xf7   : > { %2783 = vmatprep.mubr.bf16.mxu1 %v538_v53 }
  0xf8   : > { %2784 = vmatmul.mubr.bf16.gmra.mrb[4].mxu1 %v539_v52 }
  0xf9   : > { %2792 = vmatpush3.bf16.msra.mxu1 %v2968_v58 }
  0xfa   : > { %2793 = vmatprep.subr.bf16.mxu1 %v2969_v59 }
  0xfd   : > { %2794 = vmatpush3.bf16.msra.mxu1 %v2969_v59 }
  0xfe   : > { %2795 = vmatprep.subr.bf16.mxu1 %v2970_v34 }
 0x101   : > { %2796 = vmatpush3.bf16.msra.mxu1 %v2970_v34  ;;  %v2983_v34 = vld [vmem:[%s3769_s5 + $0xa0] sm:$0xff]  }
 0x102   : > { %2797 = vmatprep.subr.bf16.mxu1 %v2971_v35 }
 0x105   : > { %2798 = vmatpush3.bf16.msra.mxu1 %v2971_v35  ;;  %v2986_v35 = vld [vmem:[%s3767_s3 + $0x88] sm:$0xff]  }
 0x106   : > { %2799 = vmatprep.subr.bf16.mxu1 %v2972_v36 }
 0x109   : > { %2800 = vmatpush3.bf16.msra.mxu1 %v2972_v36  ;;  %v2987_v36 = vld [vmem:[%s3767_s3 + $0x90] sm:$0xff]  }
 0x1c3   : > { %v2781_v61 = vpop.f32.mrb[0].mxu1 }
 0x1c4   : > { %v654_v62 = vadd.f32 %v2781_v61, %v2392_v60  ;;  %v645_v63 = vpop.f32.mrb[1].mxu1 }
 0x1c5   : > { %v646_v0 = vadd.f32 %v2392_v60, %v645_v63  ;;  %v2782_v1 = vpop.f32.mrb[2].mxu1 }
 0x1c6   : > { %v657_v2 = vadd.f32 %v2782_v1, %v2392_v60  ;;  %v648_v3 = vpop.f32.mrb[3].mxu1  ;;  %v678_v5 = vmax.f32 %v654_v62, 0.0 }
 0x1c7   : > { %v649_v4 = vadd.f32 %v2392_v60, %v648_v3  ;;  %v676_v10 = vmax.f32 %v646_v0, 0.0 }
 0x1c8   : > { %v679_v7 = vmax.f32 %v657_v2, 0.0 }
 0x1c9   : > { %v677_v12 = vmax.f32 %v649_v4, 0.0 }
 0x1ca   : > { %v685_v13 = vpack.c.bf16 %v679_v7, %v678_v5 }
 0x1cb   : > { %v684_v14 = vpack.c.bf16 %v677_v12, %v676_v10  ;;  %v2785_v15 = vpop.f32.mrb[4].mxu1 }
 0x1cc   : > { %v670_v17 = vadd.f32 %v2785_v15, %v2392_v60  ;;  %v661_v18 = vpop.f32.mrb[5].mxu1 }
 0x1cd   : > { %v662_v19 = vadd.f32 %v2392_v60, %v661_v18  ;;  %816 = vmatmul.mubr.bf16.vlgmr.msra.gmra.mrb[8].mxu0 %v684_v14  ;;  %v2786_v20 = vpop.f32.mrb[6].mxu1 }
 0x1ce   : > { %v682_v21 = vmax.f32 %v670_v17, 0.0  ;;  %v673_v22 = vadd.f32 %v2786_v20, %v2392_v60  ;;  %v664_v23 = vpop.f32.mrb[7].mxu1  ;;  %2414 = vmatprep.mubr.msk.bf16.mxu0 %vm450_vm0, %v3163_v8  ;;  %1116 = vmatpush1.bf16.msra.mxu0 %v2974_v37  ;;  %v2434_v37 = vld [vmem:[%s3768_s4 + $0x1] ss:$0 sm:$0xff] }
 0x1cf   : > { %v680_v24 = vmax.f32 %v662_v19, 0.0  ;;  %v665_v25 = vadd.f32 %v2392_v60, %v664_v23  ;;  %1117 = vmatprep.subr.bf16.mxu0 %v3059_v16 }
 0x1d0   : > { %v683_v26 = vmax.f32 %v673_v22, 0.0 }
 0x1d1   : > { %v681_v27 = vmax.f32 %v665_v25, 0.0 }
 0x1d2   : > { %v687_v29 = vpack.c.bf16 %v683_v26, %v682_v21  ;;  %1118 = vmatpush1.bf16.msra.mxu0 %v2975_v38 }
 0x1d3   : > { %v686_v32 = vpack.c.bf16 %v681_v27, %v680_v24  ;;  %1119 = vmatprep.subr.bf16.mxu0 %v3059_v16 }
 0x1d5   : > { %824 = vmatmul.mubr.bf16.gmra.mrb[12].mxu0 %v685_v13 }
 0x1d6   : > { %2415 = vmatprep.mubr.msk.bf16.mxu0 %vm450_vm0, %v3166_v9  ;;  %1120 = vmatpush1.bf16.msra.mxu0 %v2976_v39 }
 0x1d7   : > { %1121 = vmatprep.subr.bf16.mxu0 %v3059_v16 }
 0x1da   : > { %1122 = vmatpush1.bf16.msra.mxu0 %v2977_v41 }
 0x1db   : > { %1123 = vmatprep.subr.bf16.mxu0 %v3059_v16 }
 0x1dd   : > { %832 = vmatmul.mubr.bf16.gmra.mrb[16].mxu0 %v686_v32 }
 0x1de   : > { %2416 = vmatprep.mubr.msk.bf16.mxu0 %vm450_vm0, %v3176_v11  ;;  %1124 = vmatpush1.bf16.msra.mxu0 %v2978_v42 }
 0x1df   : > { %1125 = vmatprep.subr.bf16.mxu0 %v3059_v16 }
 0x1e2   : > { %1126 = vmatpush1.bf16.msra.mxu0 %v2979_v44 }
 0x1e3   : > { %1127 = vmatprep.subr.bf16.mxu0 %v3059_v16 }
 0x1e5   : > { %840 = vmatmul.mubr.bf16.gmra.mrb[20].mxu0 %v687_v29 }
 0x1e6   : > { %2478 = vmatprep.mubr.msk.bf16.mxu0 %vm450_vm0, %v3155_v6  ;;  %v2973_v6 = vld [vmem:[%s3767_s3 + $0x78] sm:$0xff]   ;;  %1128 = vmatpush1.bf16.msra.mxu0 %v2980_v45 }
 0x1e7   : > { %2801 = vmatprep.subr.bf16.mxu1 %v2973_v6  ;;  %1129 = vmatprep.subr.bf16.mxu0 %v3059_v16 }
 0x1e8   : > { %2802 = vmatpush3.bf16.msra.mxu1 %v2973_v6  ;;  %v2988_v6 = vld [vmem:[%s3767_s3 + $0x98] sm:$0xff]  }
 0x1ea   : > { %1130 = vmatpush1.bf16.msra.mxu0 %v2981_v47 }
 0x1eb   : > { %1131 = vmatprep.subr.bf16.mxu0 %v3059_v16 }
 0x1ee   : > { %1132 = vmatpush1.bf16.msra.mxu0 %v2982_v48 }
 0x1ef   : > { %1133 = vmatprep.subr.bf16.mxu0 %v3059_v16 }
 0x1f2   : > { %1134 = vmatpush1.bf16.msra.mxu0 %v2983_v34 }
 0x1f3   : > { %1135 = vmatprep.subr.bf16.mxu0 %v3059_v16 }
 0x2a0   : > { %v817_v51 = vpop.f32.mrb[8].mxu0 }
 0x2a1   : > { %v818_v52 = vadd.f32 %v2401_v50, %v817_v51  ;;  %v819_v53 = vpop.f32.mrb[9].mxu0 }
 0x2a2   : > { %v820_v54 = vpop.f32.mrb[10].mxu0 }
 0x2a3   : > { %v3338_v55 = vadd.f32 %v818_v52, %v3231_v28  ;;  %v821_v56 = vadd.f32 %v2401_v50, %v820_v54  ;;  %v822_v57 = vpop.f32.mrb[11].mxu0 }
 0x2a5   : > { %v3341_v58 = vadd.f32 %v821_v56, %v3237_v33  ;;  %v856_v59 = vmax.f32 %v3338_v55, 0.0 }
 0x2a7   : > { %v857_v60 = vmax.f32 %v3341_v58, 0.0 }
 0x2a8   : > { %v825_v61 = vpop.f32.mrb[12].mxu0 }
 0x2a9   : > { %v826_v62 = vadd.f32 %v2401_v50, %v825_v61  ;;  %v827_v63 = vpop.f32.mrb[13].mxu0  ;;  %v864_v0 = vpack.c.bf16 %v857_v60, %v856_v59 }
 0x2aa   : > { %v828_v1 = vpop.f32.mrb[14].mxu0 }
 0x2ab   : > { %v3346_v2 = vadd.f32 %v826_v62, %v3233_v30  ;;  %v829_v3 = vadd.f32 %v2401_v50, %v828_v1  ;;  %v830_v28 = vpop.f32.mrb[15].mxu0  ;;  %2803 = vmatprep.mubr.bf16.mxu1 %v864_v0 }
 0x2ad   : > { %v3349_v4 = vadd.f32 %v829_v3, %v3235_v31  ;;  %v858_v33 = vmax.f32 %v3346_v2, 0.0 }
 0x2af   : > { %v859_v5 = vmax.f32 %v3349_v4, 0.0 }
 0x2b0   : > { %v833_v7 = vpop.f32.mrb[16].mxu0 }
 0x2b1   : > { %v865_v10 = vpack.c.bf16 %v859_v5, %v858_v33  ;;  %v834_v12 = vadd.f32 %v2401_v50, %v833_v7  ;;  %v835_v13 = vpop.f32.mrb[17].mxu0 }
 0x2b2   : > { %v836_v14 = vpop.f32.mrb[18].mxu0  ;;  %v2466_v13 = vld [vmem:[%s3770_s6 + $0x1] ss:$0 sm:$0xff] }
 0x2b3   : > { %v3354_v15 = vadd.f32 %v834_v12, %v3245_v43  ;;  %v837_v30 = vadd.f32 %v2401_v50, %v836_v14  ;;  %v838_v17 = vpop.f32.mrb[19].mxu0  ;;  %2804 = vmatmul.mubr.bf16.vlgmr.msra.gmra.mrb[8].mxu1 %v865_v10  ;;  %v2991_v12 = vld [vmem:[%s3767_s3 + $0xb0] sm:$0xff]  }
 0x2b5   : > { %v3357_v18 = vadd.f32 %v837_v30, %v3251_v49  ;;  %v860_v31 = vmax.f32 %v3354_v15, 0.0 }
 0x2b7   : > { %v861_v19 = vmax.f32 %v3357_v18, 0.0 }
 0x2b8   : > { %v841_v20 = vpop.f32.mrb[20].mxu0 }
 0x2b9   : > { %v842_v21 = vadd.f32 %v2401_v50, %v841_v20  ;;  %v843_v22 = vpop.f32.mrb[21].mxu0  ;;  %v866_v23 = vpack.c.bf16 %v861_v19, %v860_v31 }
 0x2ba   : > { %v844_v24 = vpop.f32.mrb[22].mxu0 }
 0x2bb   : > { %v3362_v25 = vadd.f32 %v842_v21, %v3243_v40  ;;  %v845_v43 = vadd.f32 %v2401_v50, %v844_v24  ;;  %v846_v26 = vpop.f32.mrb[23].mxu0  ;;  %2807 = vmatprep.mubr.bf16.mxu1 %v866_v23  ;;  %v2984_v40 = vld [vmem:[%s3769_s5 + $0xa8] sm:$0xff]  }
 0x2bc   : > { %1136 = vmatpush1.bf16.msra.mxu0 %v2984_v40 }
 0x2bd   : > { %v3365_v27 = vadd.f32 %v845_v43, %v3248_v46  ;;  %v862_v49 = vmax.f32 %v3362_v25, 0.0  ;;  %v2985_v46 = vld [vmem:[%s3767_s3 + $0x80] sm:$0xff]  }
 0x2be   : > { %2811 = vmatprep.subr.bf16.mxu1 %v2985_v46 }
 0x2bf   : > { %v863_v29 = vmax.f32 %v3365_v27, 0.0  ;;  %2812 = vmatpush3.bf16.msra.mxu1 %v2985_v46 }
 0x2c0   : > { %2813 = vmatprep.subr.bf16.mxu1 %v2986_v35 }
 0x2c1   : > { %v867_v32 = vpack.c.bf16 %v863_v29, %v862_v49 }
 0x2c3   : > { %2808 = vmatmul.mubr.bf16.gmra.mrb[12].mxu1 %v867_v32 }
 0x2c4   : > { %2814 = vmatpush3.bf16.msra.mxu1 %v2986_v35 }
 0x2c5   : > { %2815 = vmatprep.subr.bf16.mxu1 %v2987_v36 }
 0x2c8   : > { %2816 = vmatpush3.bf16.msra.mxu1 %v2987_v36 }
 0x2c9   : > { %2817 = vmatprep.subr.bf16.mxu1 %v2988_v6 }
 0x2cc   : > { %2818 = vmatpush3.bf16.msra.mxu1 %v2988_v6  ;;  %v2993_v6 = vld [vmem:[%s3769_s5 + $0xb0] sm:$0xff]  }
 0x386   : > { %v2805_v38 = vpop.f32.mrb[8].mxu1 }
 0x387   : > { %v984_v39 = vadd.f32 %v2805_v38, %v2434_v37  ;;  %v975_v41 = vpop.f32.mrb[9].mxu1 }
 0x388   : > { %v976_v42 = vadd.f32 %v2434_v37, %v975_v41  ;;  %v2806_v44 = vpop.f32.mrb[10].mxu1 }
 0x389   : > { %v987_v45 = vadd.f32 %v2806_v44, %v2434_v37  ;;  %v978_v47 = vpop.f32.mrb[11].mxu1  ;;  %v1008_v50 = vmax.f32 %v984_v39, 0.0 }
 0x38a   : > { %v979_v48 = vadd.f32 %v2434_v37, %v978_v47  ;;  %v1006_v52 = vmax.f32 %v976_v42, 0.0 }
 0x38b   : > { %v1009_v51 = vmax.f32 %v987_v45, 0.0 }
 0x38c   : > { %v1007_v53 = vmax.f32 %v979_v48, 0.0 }
 0x38d   : > { %v1015_v54 = vpack.c.bf16 %v1009_v51, %v1008_v50 }
 0x38e   : > { %v1014_v56 = vpack.c.bf16 %v1007_v53, %v1006_v52 }
 0x390   : > { %1148 = vmatmul.mubr.bf16.vlgmr.msra.gmra.mrb[24].mxu0 %v1014_v56 }
 0x391   : > { %2479 = vmatprep.mubr.msk.bf16.mxu0 %vm450_vm0, %v3163_v8  ;;  %v2989_v8 = vld [vmem:[%s3767_s3 + $0xa0] sm:$0xff]  }
 0x392   : > { %2819 = vmatprep.subr.bf16.mxu1 %v2989_v8 }
 0x393   : > { %2820 = vmatpush3.bf16.msra.mxu1 %v2989_v8  ;;  %v3006_v8 = vld [vmem:[%s3767_s3 + $0xd0] sm:$0xff]  }
 0x396   : > { %v2809_v57 = vpop.f32.mrb[12].mxu1 }
 0x397   : > { %v1000_v59 = vadd.f32 %v2809_v57, %v2434_v37  ;;  %v991_v60 = vpop.f32.mrb[13].mxu1 }
 0x398   : > { %v992_v61 = vadd.f32 %v2434_v37, %v991_v60  ;;  %v2810_v62 = vpop.f32.mrb[14].mxu1  ;;  %1156 = vmatmul.mubr.bf16.gmra.mrb[28].mxu0 %v1015_v54 }
 0x399   : > { %v1003_v63 = vadd.f32 %v2810_v62, %v2434_v37  ;;  %v994_v0 = vpop.f32.mrb[15].mxu1  ;;  %2480 = vmatprep.mubr.msk.bf16.mxu0 %vm450_vm0, %v3166_v9  ;;  %v1012_v3 = vmax.f32 %v1000_v59, 0.0  ;;  %v2990_v9 = vld [vmem:[%s3767_s3 + $0xa8] sm:$0xff]  }
 0x39a   : > { %v995_v1 = vadd.f32 %v2434_v37, %v994_v0  ;;  %v1010_v33 = vmax.f32 %v992_v61, 0.0  ;;  %2821 = vmatprep.subr.bf16.mxu1 %v2990_v9  ;;  %v2996_v59 = vld [vmem:[%s3769_s5 + $0xc8] sm:$0xff]   ;;  %v3468_v0 = vld [vmem:[%s3149_s14] sm:$0xff]  }
 0x39b   : > { %v1013_v28 = vmax.f32 %v1003_v63, 0.0  ;;  %2822 = vmatpush3.bf16.msra.mxu1 %v2990_v9  ;;  %v3007_v9 = vld [vmem:[%s3767_s3 + $0xd8] sm:$0xff]  }
 0x39c   : > { %v1011_v5 = vmax.f32 %v995_v1, 0.0  ;;  %2823 = vmatprep.subr.bf16.mxu1 %v2991_v12  ;;  %v2999_v1 = vld [vmem:[%s3769_s5 + $0xe0] sm:$0xff]  }
 0x39d   : > { %v1017_v7 = vpack.c.bf16 %v1013_v28, %v1012_v3  ;;  %v3000_v3 = vld [vmem:[%s3769_s5 + $0xe8] sm:$0xff]   ;;  %v3001_v28 = vld [vmem:[%s3769_s5 + $0xf0] sm:$0xff]  }
 0x39e   : > { %v1016_v10 = vpack.c.bf16 %v1011_v5, %v1010_v33  ;;  %v3002_v33 = vld [vmem:[%s3769_s5 + $0xf8] sm:$0xff]   ;;  %v3003_v5 = vld [vmem:[%s3769_s5 + $0x100] sm:$0xff]  }
 0x39f   : > { %2824 = vmatpush3.bf16.msra.mxu1 %v2991_v12  ;;  %v2499_v12 = vld [vmem:[%s3768_s4 + $0x2] ss:$0 sm:$0xff] }
 0x3a0   : > { %1164 = vmatmul.mubr.bf16.gmra.mrb[32].mxu0 %v1016_v10  ;;  %v3005_v10 = vld [vmem:[%s3767_s3 + $0xc8] sm:$0xff]  }
 0x3a1   : > { %2481 = vmatprep.mubr.msk.bf16.mxu0 %vm450_vm0, %v3176_v11  ;;  %v2992_v11 = vld [vmem:[%s3767_s3 + $0xb8] sm:$0xff]  }
 0x3a2   : > { %2825 = vmatprep.subr.bf16.mxu1 %v2992_v11 }
 0x3a3   : > { %2826 = vmatpush3.bf16.msra.mxu1 %v2992_v11 }
 0x3a4   : > { %1447 = vmatprep.subr.bf16.mxu1 %v3059_v16 }
 0x3a8   : > { %1172 = vmatmul.mubr.bf16.gmra.mrb[36].mxu0 %v1017_v7  ;;  %v3004_v7 = vld [vmem:[%s3767_s3 + $0xc0] sm:$0xff]  }
 0x3a9   : > { %2835 = vmatprep.subr.bf16.mxu0 %v3004_v7 }
 0x3aa   : > { %2836 = vmatpush3.bf16.msra.mxu0 %v3004_v7 }
 0x3ab   : > { %2837 = vmatprep.subr.bf16.mxu0 %v3005_v10 }
 0x3ae   : > { %2838 = vmatpush3.bf16.msra.mxu0 %v3005_v10 }
 0x3af   : > { %2839 = vmatprep.subr.bf16.mxu0 %v3006_v8 }
 0x3b2   : > { %2840 = vmatpush3.bf16.msra.mxu0 %v3006_v8 }
 0x3b3   : > { %2841 = vmatprep.subr.bf16.mxu0 %v3007_v9 }
 0x3b6   : > { %2842 = vmatpush3.bf16.msra.mxu0 %v3007_v9 }
 0x463   : > { %v1149_v14 = vpop.f32.mrb[24].mxu0 }
 0x464   : > { %v1150_v30 = vadd.f32 %v2466_v13, %v1149_v14  ;;  %v1151_v17 = vpop.f32.mrb[25].mxu0 }
 0x465   : > { %v1152_v31 = vpop.f32.mrb[26].mxu0 }
 0x466   : > { %v3414_v19 = vadd.f32 %v1150_v30, %v3338_v55  ;;  %v1153_v20 = vadd.f32 %v2466_v13, %v1152_v31  ;;  %v1154_v21 = vpop.f32.mrb[27].mxu0 }
 0x468   : > { %v3417_v22 = vadd.f32 %v1153_v20, %v3341_v58  ;;  %v1188_v23 = vmax.f32 %v3414_v19, 0.0 }
 0x46a   : > { %v1189_v24 = vmax.f32 %v3417_v22, 0.0 }
 0x46b   : > { %v1157_v43 = vpop.f32.mrb[28].mxu0 }
 0x46c   : > { %v1158_v26 = vadd.f32 %v2466_v13, %v1157_v43  ;;  %v1159_v49 = vpop.f32.mrb[29].mxu0  ;;  %v1196_v29 = vpack.c.bf16 %v1189_v24, %v1188_v23 }
 0x46d   : > { %v1160_v32 = vpop.f32.mrb[30].mxu0 }
 0x46e   : > { %v3422_v34 = vadd.f32 %v1158_v26, %v3346_v2  ;;  %v1161_v40 = vadd.f32 %v2466_v13, %v1160_v32  ;;  %v1162_v55 = vpop.f32.mrb[31].mxu0  ;;  %2827 = vmatprep.mubr.bf16.mxu1 %v1196_v29  ;;  %v3509_v32 = vld [vmem:[%s3149_s14 + $0x8] sm:$0xff]  }
 0x470   : > { %v3425_v46 = vadd.f32 %v1161_v40, %v3349_v4  ;;  %v1190_v58 = vmax.f32 %v3422_v34, 0.0  ;;  %v2994_v4 = vld [vmem:[%s3769_s5 + $0xb8] sm:$0xff]  }
 0x472   : > { %v1191_v35 = vmax.f32 %v3425_v46, 0.0 }
 0x473   : > { %v1165_v36 = vpop.f32.mrb[32].mxu0 }
 0x474   : > { %v1197_v37 = vpack.c.bf16 %v1191_v35, %v1190_v58  ;;  %v1166_v38 = vadd.f32 %v2466_v13, %v1165_v36  ;;  %v1167_v39 = vpop.f32.mrb[33].mxu0 }
 0x475   : > { %v1168_v2 = vpop.f32.mrb[34].mxu0 }
 0x476   : > { %v3433_v41 = vadd.f32 %v1166_v38, %v3354_v15  ;;  %v1169_v42 = vadd.f32 %v2466_v13, %v1168_v2  ;;  %v1170_v44 = vpop.f32.mrb[35].mxu0  ;;  %2828 = vmatmul.mubr.bf16.vlgmr.msra.gmra.mrb[16].mxu1 %v1197_v37  ;;  %v2995_v15 = vld [vmem:[%s3769_s5 + $0xc0] sm:$0xff]   ;;  %v3514_v38 = vld [vmem:[%s3149_s14 + $0x10] sm:$0xff]  }
 0x477   : > { %1448 = vmatpush1.bf16.msra.mxu1 %v2993_v6 }
 0x478   : > { %v3439_v45 = vadd.f32 %v1169_v42, %v3357_v18  ;;  %1449 = vmatprep.subr.bf16.mxu1 %v3059_v16  ;;  %v1192_v47 = vmax.f32 %v3433_v41, 0.0 }
 0x47a   : > { %v1193_v48 = vmax.f32 %v3439_v45, 0.0 }
 0x47b   : > { %v1173_v50 = vpop.f32.mrb[36].mxu0  ;;  %1450 = vmatpush1.bf16.msra.mxu1 %v2994_v4 }
 0x47c   : > { %v1174_v51 = vadd.f32 %v2466_v13, %v1173_v50  ;;  %v1175_v52 = vpop.f32.mrb[37].mxu0  ;;  %v1198_v53 = vpack.c.bf16 %v1193_v48, %v1192_v47  ;;  %1451 = vmatprep.subr.bf16.mxu1 %v3059_v16  ;;  %v3519_v50 = vld [vmem:[%s3149_s14 + $0x18] sm:$0xff]  }
 0x47d   : > { %v1176_v54 = vpop.f32.mrb[38].mxu0  ;;  %v3010_v52 = vld [vmem:[%s3767_s3 + $0xf0] sm:$0xff]  }
 0x47e   : > { %v3449_v18 = vadd.f32 %v1174_v51, %v3362_v25  ;;  %v1177_v56 = vadd.f32 %v2466_v13, %v1176_v54  ;;  %v1178_v57 = vpop.f32.mrb[39].mxu0  ;;  %2831 = vmatprep.mubr.bf16.mxu1 %v1198_v53  ;;  %v2997_v25 = vld [vmem:[%s3769_s5 + $0xd0] sm:$0xff]   ;;  %v3009_v51 = vld [vmem:[%s3767_s3 + $0xe8] sm:$0xff]   ;;  %v3011_v53 = vld [vmem:[%s3767_s3 + $0xf8] sm:$0xff]  }
 0x47f   : > { %1452 = vmatpush1.bf16.msra.mxu1 %v2995_v15  ;;  %v3008_v15 = vld [vmem:[%s3767_s3 + $0xe0] sm:$0xff]  }
 0x480   : > { %v3455_v60 = vadd.f32 %v1177_v56, %v3365_v27  ;;  %1453 = vmatprep.subr.bf16.mxu1 %v3059_v16  ;;  %v1194_v61 = vmax.f32 %v3449_v18, 0.0  ;;  %v2998_v27 = vld [vmem:[%s3769_s5 + $0xd8] sm:$0xff]   ;;  %2843 = vmatprep.subr.bf16.mxu0 %v3008_v15  ;;  %v2531_v54 = vld [vmem:[%s3770_s6 + $0x2] ss:$0 sm:$0xff] }
 0x481   : > { %2844 = vmatpush3.bf16.msra.mxu0 %v3008_v15  ;;  %v3023_v15 = vld [vmem:[%s3767_s3 + $0x100] sm:$0xff]  }
 0x482   : > { %v1195_v62 = vmax.f32 %v3455_v60, 0.0  ;;  %2845 = vmatprep.subr.bf16.mxu0 %v3009_v51 }
 0x483   : > { %1454 = vmatpush1.bf16.msra.mxu1 %v2996_v59 }
 0x484   : > { %v1199_v63 = vpack.c.bf16 %v1195_v62, %v1194_v61  ;;  %1455 = vmatprep.subr.bf16.mxu1 %v3059_v16 }
 0x485   : > { %2846 = vmatpush3.bf16.msra.mxu0 %v3009_v51  ;;  %v3024_v51 = vld [vmem:[%s3767_s3 + $0x108] sm:$0xff]  }
 0x486   : > { %2832 = vmatmul.mubr.bf16.gmra.mrb[20].mxu1 %v1199_v63  ;;  %2847 = vmatprep.subr.bf16.mxu0 %v3010_v52 }
 0x487   : > { %1456 = vmatpush1.bf16.msra.mxu1 %v2997_v25  ;;  %2543 = vmatprep.mubr.msk.bf16.mxu1 %vm450_vm0, %v3468_v0 }
 0x488   : > { %1457 = vmatprep.subr.bf16.mxu1 %v3059_v16 }
 0x489   : > { %2848 = vmatpush3.bf16.msra.mxu0 %v3010_v52  ;;  %v3026_v52 = vld [vmem:[%s3767_s3 + $0x118] sm:$0xff]  }
 0x48a   : > { %2849 = vmatprep.subr.bf16.mxu0 %v3011_v53 }
 0x48b   : > { %1458 = vmatpush1.bf16.msra.mxu1 %v2998_v27 }
 0x48c   : > { %1459 = vmatprep.subr.bf16.mxu1 %v3059_v16 }
 0x48d   : > { %2850 = vmatpush3.bf16.msra.mxu0 %v3011_v53  ;;  %v2564_v53 = vld [vmem:[%s3768_s4 + $0x3] ss:$0 sm:$0xff] }
 0x48e   : > { %1779 = vmatprep.subr.bf16.mxu0 %v3059_v16 }
 0x48f   : > { %1460 = vmatpush1.bf16.msra.mxu1 %v2999_v1 }
 0x490   : > { %1461 = vmatprep.subr.bf16.mxu1 %v3059_v16 }
 0x493   : > { %1462 = vmatpush1.bf16.msra.mxu1 %v3000_v3 }
 0x494   : > { %1463 = vmatprep.subr.bf16.mxu1 %v3059_v16 }
 0x497   : > { %1464 = vmatpush1.bf16.msra.mxu1 %v3001_v28 }
 0x498   : > { %1465 = vmatprep.subr.bf16.mxu1 %v3059_v16 }
 0x49b   : > { %1466 = vmatpush1.bf16.msra.mxu1 %v3002_v33 }
 0x49c   : > { %1467 = vmatprep.subr.bf16.mxu1 %v3059_v16 }
 0x49f   : > { %1468 = vmatpush1.bf16.msra.mxu1 %v3003_v5 }
 0x4a0   : > { %2859 = vmatprep.subr.bf16.mxu1 %v3023_v15 }
 0x549   : > { %v2829_v11 = vpop.f32.mrb[16].mxu1 }
 0x54a   : > { %v1316_v13 = vadd.f32 %v2829_v11, %v2499_v12  ;;  %v1307_v14 = vpop.f32.mrb[17].mxu1 }
 0x54b   : > { %v1308_v30 = vadd.f32 %v2499_v12, %v1307_v14  ;;  %v2830_v17 = vpop.f32.mrb[18].mxu1  ;;  %v3012_v14 = vld [vmem:[%s3769_s5 + $0x108] sm:$0xff]  }
 0x54c   : > { %v1319_v31 = vadd.f32 %v2830_v17, %v2499_v12  ;;  %v1310_v20 = vpop.f32.mrb[19].mxu1  ;;  %v1340_v23 = vmax.f32 %v1316_v13, 0.0 }
 0x54d   : > { %v1311_v21 = vadd.f32 %v2499_v12, %v1310_v20  ;;  %v1338_v43 = vmax.f32 %v1308_v30, 0.0 }
 0x54e   : > { %v1341_v24 = vmax.f32 %v1319_v31, 0.0 }
 0x54f   : > { %v1339_v26 = vmax.f32 %v1311_v21, 0.0 }
 0x550   : > { %v1347_v49 = vpack.c.bf16 %v1341_v24, %v1340_v23 }
 0x551   : > { %v1346_v29 = vpack.c.bf16 %v1339_v26, %v1338_v43 }
 0x553   : > { %1480 = vmatmul.mubr.bf16.vlgmr.msra.gmra.mrb[24].mxu1 %v1346_v29 }
 0x554   : > { %2544 = vmatprep.mubr.msk.bf16.mxu1 %vm450_vm0, %v3509_v32  ;;  %2860 = vmatpush3.bf16.msra.mxu1 %v3023_v15 }
 0x555   : > { %2861 = vmatprep.subr.bf16.mxu1 %v3024_v51 }
 0x558   : > { %2862 = vmatpush3.bf16.msra.mxu1 %v3024_v51 }
 0x559   : > { %v2833_v40 = vpop.f32.mrb[20].mxu1 }
 0x55a   : > { %v1332_v55 = vadd.f32 %v2833_v40, %v2499_v12  ;;  %v1323_v58 = vpop.f32.mrb[21].mxu1 }
 0x55b   : > { %v1324_v35 = vadd.f32 %v2499_v12, %v1323_v58  ;;  %v2834_v36 = vpop.f32.mrb[22].mxu1  ;;  %1488 = vmatmul.mubr.bf16.gmra.mrb[28].mxu1 %v1347_v49 }
 0x55c   : > { %v1335_v6 = vadd.f32 %v2834_v36, %v2499_v12  ;;  %v1326_v37 = vpop.f32.mrb[23].mxu1  ;;  %2545 = vmatprep.mubr.msk.bf16.mxu1 %vm450_vm0, %v3514_v38  ;;  %v1344_v2 = vmax.f32 %v1332_v55, 0.0 }
 0x55d   : > { %v1327_v39 = vadd.f32 %v2499_v12, %v1326_v37  ;;  %v1342_v44 = vmax.f32 %v1324_v35, 0.0 }
 0x55e   : > { %v1345_v42 = vmax.f32 %v1335_v6, 0.0  ;;  %v3015_v6 = vld [vmem:[%s3769_s5 + $0x120] sm:$0xff]  }
 0x55f   : > { %v1343_v4 = vmax.f32 %v1327_v39, 0.0 }
 0x560   : > { %v1349_v47 = vpack.c.bf16 %v1345_v42, %v1344_v2 }
 0x561   : > { %v1348_v48 = vpack.c.bf16 %v1343_v4, %v1342_v44  ;;  %v3018_v44 = vld [vmem:[%s3769_s5 + $0x138] sm:$0xff]   ;;  %v3019_v4 = vld [vmem:[%s3769_s5 + $0x140] sm:$0xff]  }
 0x563   : > { %1496 = vmatmul.mubr.bf16.gmra.mrb[32].mxu1 %v1348_v48  ;;  %v3022_v48 = vld [vmem:[%s3769_s5 + $0x158] sm:$0xff]  }
 0x564   : > { %2546 = vmatprep.mubr.msk.bf16.mxu1 %vm450_vm0, %v3519_v50 }
 0x56b   : > { %1504 = vmatmul.mubr.bf16.gmra.mrb[36].mxu1 %v1349_v47  ;;  %v3021_v47 = vld [vmem:[%s3769_s5 + $0x150] sm:$0xff]  }
 0x626   : > { %v1481_v56 = vpop.f32.mrb[24].mxu1 }
 0x627   : > { %v1482_v57 = vadd.f32 %v2531_v54, %v1481_v56  ;;  %v1483_v59 = vpop.f32.mrb[25].mxu1 }
 0x628   : > { %v1484_v61 = vpop.f32.mrb[26].mxu1 }
 0x629   : > { %v3540_v62 = vadd.f32 %v1482_v57, %v3414_v19  ;;  %v1485_v25 = vadd.f32 %v2531_v54, %v1484_v61  ;;  %v1486_v63 = vpop.f32.mrb[27].mxu1 }
 0x62b   : > { %v3543_v27 = vadd.f32 %v1485_v25, %v3417_v22  ;;  %v1520_v1 = vmax.f32 %v3540_v62, 0.0 }
 0x62d   : > { %v1521_v3 = vmax.f32 %v3543_v27, 0.0 }
 0x62e   : > { %v1489_v28 = vpop.f32.mrb[28].mxu1 }
 0x62f   : > { %v1490_v33 = vadd.f32 %v2531_v54, %v1489_v28  ;;  %v1491_v5 = vpop.f32.mrb[29].mxu1  ;;  %v1528_v7 = vpack.c.bf16 %v1521_v3, %v1520_v1 }
 0x630   : > { %v1492_v10 = vpop.f32.mrb[30].mxu1 }
 0x631   : > { %v3548_v8 = vadd.f32 %v1490_v33, %v3422_v34  ;;  %v1493_v9 = vadd.f32 %v2531_v54, %v1492_v10  ;;  %v1494_v19 = vpop.f32.mrb[31].mxu1  ;;  %2851 = vmatprep.mubr.bf16.mxu0 %v1528_v7 }
 0x633   : > { %v3551_v12 = vadd.f32 %v1493_v9, %v3425_v46  ;;  %v1522_v22 = vmax.f32 %v3548_v8, 0.0  ;;  %v3013_v46 = vld [vmem:[%s3769_s5 + $0x110] sm:$0xff]  }
 0x635   : > { %v1523_v11 = vmax.f32 %v3551_v12, 0.0 }
 0x636   : > { %v1497_v13 = vpop.f32.mrb[32].mxu1 }
 0x637   : > { %v1529_v30 = vpack.c.bf16 %v1523_v11, %v1522_v22  ;;  %v1498_v17 = vadd.f32 %v2531_v54, %v1497_v13  ;;  %v1499_v31 = vpop.f32.mrb[33].mxu1 }
 0x638   : > { %v1500_v34 = vpop.f32.mrb[34].mxu1 }
 0x639   : > { %v3559_v20 = vadd.f32 %v1498_v17, %v3433_v41  ;;  %v1501_v21 = vadd.f32 %v2531_v54, %v1500_v34  ;;  %v1502_v23 = vpop.f32.mrb[35].mxu1  ;;  %2852 = vmatmul.mubr.bf16.vlgmr.msra.gmra.mrb[40].mxu0 %v1529_v30  ;;  %v3014_v41 = vld [vmem:[%s3769_s5 + $0x118] sm:$0xff]  }
 0x63a   : > { %1780 = vmatpush1.bf16.msra.mxu0 %v3012_v14 }
 0x63b   : > { %v3565_v24 = vadd.f32 %v1501_v21, %v3439_v45  ;;  %1781 = vmatprep.subr.bf16.mxu0 %v3059_v16  ;;  %v1524_v43 = vmax.f32 %v3559_v20, 0.0 }
 0x63d   : > { %v1525_v26 = vmax.f32 %v3565_v24, 0.0 }
 0x63e   : > { %v1505_v49 = vpop.f32.mrb[36].mxu1  ;;  %1782 = vmatpush1.bf16.msra.mxu0 %v3013_v46 }
 0x63f   : > { %v1506_v29 = vadd.f32 %v2531_v54, %v1505_v49  ;;  %v1507_v40 = vpop.f32.mrb[37].mxu1  ;;  %v1530_v55 = vpack.c.bf16 %v1525_v26, %v1524_v43  ;;  %1783 = vmatprep.subr.bf16.mxu0 %v3059_v16  ;;  %v3029_v26 = vld [vmem:[%s3767_s3 + $0x130] sm:$0xff]   ;;  %v3031_v49 = vld [vmem:[%s3771_s7] sm:$0xff]  }
 0x640   : > { %v1508_v58 = vpop.f32.mrb[38].mxu1 }
 0x641   : > { %v3575_v45 = vadd.f32 %v1506_v29, %v3449_v18  ;;  %v1509_v35 = vadd.f32 %v2531_v54, %v1508_v58  ;;  %v1510_v36 = vpop.f32.mrb[39].mxu1  ;;  %2855 = vmatprep.mubr.bf16.mxu0 %v1530_v55  ;;  %v3016_v18 = vld [vmem:[%s3769_s5 + $0x128] sm:$0xff]  }
 0x642   : > { %1784 = vmatpush1.bf16.msra.mxu0 %v3014_v41  ;;  %v2596_v41 = vld [vmem:[%s3770_s6 + $0x3] ss:$0 sm:$0xff] }
 0x643   : > { %v3581_v37 = vadd.f32 %v1509_v35, %v3455_v60  ;;  %1785 = vmatprep.subr.bf16.mxu0 %v3059_v16  ;;  %v1526_v39 = vmax.f32 %v3575_v45, 0.0  ;;  %v3017_v60 = vld [vmem:[%s3769_s5 + $0x130] sm:$0xff]  }
 0x645   : > { %v1527_v2 = vmax.f32 %v3581_v37, 0.0 }
 0x646   : > { %1786 = vmatpush1.bf16.msra.mxu0 %v3015_v6 }
 0x647   : > { %v1531_v42 = vpack.c.bf16 %v1527_v2, %v1526_v39  ;;  %1787 = vmatprep.subr.bf16.mxu0 %v3059_v16 }
 0x649   : > { %2856 = vmatmul.mubr.bf16.gmra.mrb[44].mxu0 %v1531_v42 }
 0x64a   : > { %1788 = vmatpush1.bf16.msra.mxu0 %v3016_v18  ;;  %2608 = vmatprep.mubr.msk.bf16.mxu0 %vm450_vm0, %v3468_v0  ;;  %v3020_v0 = vld [vmem:[%s3769_s5 + $0x148] sm:$0xff]  }
 0x64b   : > { %1789 = vmatprep.subr.bf16.mxu0 %v3059_v16 }
 0x64e   : > { %1790 = vmatpush1.bf16.msra.mxu0 %v3017_v60 }
 0x64f   : > { %1791 = vmatprep.subr.bf16.mxu0 %v3059_v16 }
 0x652   : > { %1792 = vmatpush1.bf16.msra.mxu0 %v3018_v44 }
 0x653   : > { %1793 = vmatprep.subr.bf16.mxu0 %v3059_v16 }
 0x656   : > { %1794 = vmatpush1.bf16.msra.mxu0 %v3019_v4 }
 0x657   : > { %1795 = vmatprep.subr.bf16.mxu0 %v3059_v16 }
 0x65a   : > { %1796 = vmatpush1.bf16.msra.mxu0 %v3020_v0 }
 0x65b   : > { %1797 = vmatprep.subr.bf16.mxu0 %v3059_v16 }
 0x65e   : > { %1798 = vmatpush1.bf16.msra.mxu0 %v3021_v47 }
 0x65f   : > { %1799 = vmatprep.subr.bf16.mxu0 %v3059_v16  ;;  %v3025_v16 = vld [vmem:[%s3767_s3 + $0x110] sm:$0xff]  }
 0x660   : > { %2863 = vmatprep.subr.bf16.mxu1 %v3025_v16 }
 0x661   : > { %2864 = vmatpush3.bf16.msra.mxu1 %v3025_v16 }
 0x662   : > { %1800 = vmatpush1.bf16.msra.mxu0 %v3022_v48  ;;  %2865 = vmatprep.subr.bf16.mxu1 %v3026_v52 }
 0x665   : > { %2866 = vmatpush3.bf16.msra.mxu1 %v3026_v52 }
 0x70c   : > { %v2853_v54 = vpop.f32.mrb[40].mxu0 }
 0x70d   : > { %v1648_v56 = vadd.f32 %v2853_v54, %v2564_v53  ;;  %v1639_v57 = vpop.f32.mrb[41].mxu0 }
 0x70e   : > { %v1640_v59 = vadd.f32 %v2564_v53, %v1639_v57  ;;  %v2854_v61 = vpop.f32.mrb[42].mxu0 }
 0x70f   : > { %v1651_v25 = vadd.f32 %v2854_v61, %v2564_v53  ;;  %v1642_v63 = vpop.f32.mrb[43].mxu0  ;;  %v1672_v3 = vmax.f32 %v1648_v56, 0.0  ;;  %v3032_v56 = vld [vmem:[%s3771_s7 + $0x8] sm:$0xff]  }
 0x710   : > { %v1643_v1 = vadd.f32 %v2564_v53, %v1642_v63  ;;  %v1670_v33 = vmax.f32 %v1640_v59, 0.0 }
 0x711   : > { %v1673_v28 = vmax.f32 %v1651_v25, 0.0  ;;  %v3033_v25 = vld [vmem:[%s3771_s7 + $0x10] sm:$0xff]  }
 0x712   : > { %v1671_v5 = vmax.f32 %v1643_v1, 0.0 }
 0x713   : > { %v1679_v7 = vpack.c.bf16 %v1673_v28, %v1672_v3 }
 0x714   : > { %v1678_v10 = vpack.c.bf16 %v1671_v5, %v1670_v33 }
 0x716   : > { %1812 = vmatmul.mubr.bf16.vlgmr.msra.gmra.mrb[48].mxu0 %v1678_v10 }
 0x717   : > { %2609 = vmatprep.mubr.msk.bf16.mxu0 %vm450_vm0, %v3509_v32  ;;  %v3027_v32 = vld [vmem:[%s3767_s3 + $0x120] sm:$0xff]  }
 0x718   : > { %2867 = vmatprep.subr.bf16.mxu1 %v3027_v32 }
 0x719   : > { %2868 = vmatpush3.bf16.msra.mxu1 %v3027_v32 }
 0x71c   : > { %v2857_v9 = vpop.f32.mrb[44].mxu0 }
 0x71d   : > { %v1664_v19 = vadd.f32 %v2857_v9, %v2564_v53  ;;  %v1655_v22 = vpop.f32.mrb[45].mxu0 }
 0x71e   : > { %v1656_v11 = vadd.f32 %v2564_v53, %v1655_v22  ;;  %v2858_v13 = vpop.f32.mrb[46].mxu0  ;;  %1820 = vmatmul.mubr.bf16.gmra.mrb[52].mxu0 %v1679_v7  ;;  %v3035_v22 = vld [vmem:[%s3771_s7 + $0x20] sm:$0xff]  }
 0x71f   : > { %v1667_v14 = vadd.f32 %v2858_v13, %v2564_v53  ;;  %v1658_v30 = vpop.f32.mrb[47].mxu0  ;;  %2610 = vmatprep.mubr.msk.bf16.mxu0 %vm450_vm0, %v3514_v38  ;;  %v1676_v31 = vmax.f32 %v1664_v19, 0.0  ;;  %v3028_v38 = vld [vmem:[%s3767_s3 + $0x128] sm:$0xff]  }
 0x720   : > { %v1659_v17 = vadd.f32 %v2564_v53, %v1658_v30  ;;  %v1674_v21 = vmax.f32 %v1656_v11, 0.0  ;;  %2869 = vmatprep.subr.bf16.mxu1 %v3028_v38  ;;  %v3038_v30 = vld [vmem:[%s3771_s7 + $0x38] sm:$0xff]  }
 0x721   : > { %v1677_v34 = vmax.f32 %v1667_v14, 0.0  ;;  %2870 = vmatpush3.bf16.msra.mxu1 %v3028_v38 }
 0x722   : > { %v1675_v23 = vmax.f32 %v1659_v17, 0.0  ;;  %2871 = vmatprep.subr.bf16.mxu1 %v3029_v26  ;;  %v3039_v17 = vld [vmem:[%s3773_s9] sm:$0xff]  }
 0x723   : > { %v1681_v46 = vpack.c.bf16 %v1677_v34, %v1676_v31  ;;  %v3040_v31 = vld [vmem:[%s3773_s9 + $0x8] sm:$0xff]   ;;  %2907 = vmatprep.subr.bf16.mxu0 %v3039_v17  ;;  %v3041_v34 = vld [vmem:[%s3773_s9 + $0x10] sm:$0xff]  }
 0x724   : > { %v1680_v43 = vpack.c.bf16 %v1675_v23, %v1674_v21  ;;  %2908 = vmatpush3.bf16.msra.mxu0 %v3039_v17  ;;  %v3042_v21 = vld [vmem:[%s3773_s9 + $0x18] sm:$0xff]   ;;  %v3043_v23 = vld [vmem:[%s3773_s9 + $0x20] sm:$0xff]  }
 0x725   : > { %2872 = vmatpush3.bf16.msra.mxu1 %v3029_v26  ;;  %2909 = vmatprep.subr.bf16.mxu0 %v3040_v31 }
 0x726   : > { %1828 = vmatmul.mubr.bf16.gmra.mrb[56].mxu0 %v1680_v43 }
 0x727   : > { %2611 = vmatprep.mubr.msk.bf16.mxu0 %vm450_vm0, %v3519_v50  ;;  %v3030_v50 = vld [vmem:[%s3767_s3 + $0x138] sm:$0xff]  }
 0x728   : > { %2873 = vmatprep.subr.bf16.mxu1 %v3030_v50  ;;  %2910 = vmatpush3.bf16.msra.mxu0 %v3040_v31 }
 0x729   : > { %2874 = vmatpush3.bf16.msra.mxu1 %v3030_v50  ;;  %2911 = vmatprep.subr.bf16.mxu0 %v3041_v34 }
 0x72a   : > { %2883 = vmatprep.subr.bf16.mxu1 %v3031_v49 }
 0x72c   : > { %2912 = vmatpush3.bf16.msra.mxu0 %v3041_v34 }
 0x72d   : > { %2913 = vmatprep.subr.bf16.mxu0 %v3042_v21 }
 0x72e   : > { %1836 = vmatmul.mubr.bf16.gmra.mrb[60].mxu0 %v1681_v46  ;;  %v2629_v46 = vld [vmem:[%s3768_s4 + $0x4] ss:$0 sm:$0xff] }
 0x730   : > { %2914 = vmatpush3.bf16.msra.mxu0 %v3042_v21 }
 0x731   : > { %2915 = vmatprep.subr.bf16.mxu0 %v3043_v23 }
 0x734   : > { %2916 = vmatpush3.bf16.msra.mxu0 %v3043_v23 }
 0x7e9   : > { %v1813_v29 = vpop.f32.mrb[48].mxu0 }
 0x7ea   : > { %v1814_v40 = vadd.f32 %v2596_v41, %v1813_v29  ;;  %v1815_v55 = vpop.f32.mrb[49].mxu0 }
 0x7eb   : > { %v1816_v58 = vpop.f32.mrb[50].mxu0 }
 0x7ec   : > { %v3656_v35 = vadd.f32 %v1814_v40, %v3540_v62  ;;  %v1817_v36 = vadd.f32 %v2596_v41, %v1816_v58  ;;  %v1818_v6 = vpop.f32.mrb[51].mxu0 }
 0x7ee   : > { %v3659_v39 = vadd.f32 %v1817_v36, %v3543_v27  ;;  %v1852_v2 = vmax.f32 %v3656_v35, 0.0 }
 0x7f0   : > { %v1853_v18 = vmax.f32 %v3659_v39, 0.0 }
 0x7f1   : > { %v1821_v42 = vpop.f32.mrb[52].mxu0 }
 0x7f2   : > { %v1822_v60 = vadd.f32 %v2596_v41, %v1821_v42  ;;  %v1823_v44 = vpop.f32.mrb[53].mxu0  ;;  %v1860_v4 = vpack.c.bf16 %v1853_v18, %v1852_v2 }
 0x7f3   : > { %v1824_v0 = vpop.f32.mrb[54].mxu0 }
 0x7f4   : > { %v3664_v47 = vadd.f32 %v1822_v60, %v3548_v8  ;;  %v1825_v48 = vadd.f32 %v2596_v41, %v1824_v0  ;;  %v1826_v62 = vpop.f32.mrb[55].mxu0  ;;  %2875 = vmatprep.mubr.bf16.mxu1 %v1860_v4 }
 0x7f6   : > { %v3667_v15 = vadd.f32 %v1825_v48, %v3551_v12  ;;  %v1854_v27 = vmax.f32 %v3664_v47, 0.0 }
 0x7f8   : > { %v1855_v51 = vmax.f32 %v3667_v15, 0.0 }
 0x7f9   : > { %v1829_v16 = vpop.f32.mrb[56].mxu0 }
 0x7fa   : > { %v1861_v52 = vpack.c.bf16 %v1855_v51, %v1854_v27  ;;  %v1830_v53 = vadd.f32 %v2596_v41, %v1829_v16  ;;  %v1831_v54 = vpop.f32.mrb[57].mxu0 }
 0x7fb   : > { %v1832_v8 = vpop.f32.mrb[58].mxu0 }
 0x7fc   : > { %v3675_v57 = vadd.f32 %v1830_v53, %v3559_v20  ;;  %v1833_v59 = vadd.f32 %v2596_v41, %v1832_v8  ;;  %v1834_v61 = vpop.f32.mrb[59].mxu0  ;;  %2876 = vmatmul.mubr.bf16.vlgmr.msra.gmra.mrb[40].mxu1 %v1861_v52  ;;  %v3045_v8 = vld [vmem:[%s3773_s9 + $0x30] sm:$0xff]  }
 0x7fd   : > { %2884 = vmatpush3.bf16.msra.mxu1 %v3031_v49  ;;  %v2638_v61 = vld [vmem:[%s3772_s8] ss:$0 sm:$0xff] }
 0x7fe   : > { %v3678_v12 = vadd.f32 %v1833_v59, %v3565_v24  ;;  %2885 = vmatprep.subr.bf16.mxu1 %v3032_v56  ;;  %v1856_v63 = vmax.f32 %v3675_v57, 0.0  ;;  %v3034_v24 = vld [vmem:[%s3771_s7 + $0x18] sm:$0xff]  }
 0x7ff   : > { %v3046_v59 = vld [vmem:[%s3773_s9 + $0x38] sm:$0xff]  }
 0x800   : > { %v1857_v1 = vmax.f32 %v3678_v12, 0.0 }
 0x801   : > { %v1837_v3 = vpop.f32.mrb[60].mxu0  ;;  %2886 = vmatpush3.bf16.msra.mxu1 %v3032_v56  ;;  %v3044_v56 = vld [vmem:[%s3773_s9 + $0x28] sm:$0xff]  }
 0x802   : > { %v1838_v20 = vadd.f32 %v2596_v41, %v1837_v3  ;;  %v1839_v28 = vpop.f32.mrb[61].mxu0  ;;  %v1862_v33 = vpack.c.bf16 %v1857_v1, %v1856_v63  ;;  %2887 = vmatprep.subr.bf16.mxu1 %v3033_v25  ;;  %2917 = vmatprep.subr.bf16.mxu0 %v3044_v56 }
 0x803   : > { %v1840_v5 = vpop.f32.mrb[62].mxu0  ;;  %2918 = vmatpush3.bf16.msra.mxu0 %v3044_v56 }
 0x804   : > { %v3689_v7 = vadd.f32 %v1838_v20, %v3575_v45  ;;  %v1841_v10 = vadd.f32 %v2596_v41, %v1840_v5  ;;  %v1842_v9 = vpop.f32.mrb[63].mxu0  ;;  %2879 = vmatprep.mubr.bf16.mxu1 %v1862_v33  ;;  %v3036_v45 = vld [vmem:[%s3771_s7 + $0x28] sm:$0xff]   ;;  %2919 = vmatprep.subr.bf16.mxu0 %v3045_v8 }
 0x805   : > { %2888 = vmatpush3.bf16.msra.mxu1 %v3033_v25 }
 0x806   : > { %v3692_v19 = vadd.f32 %v1841_v10, %v3581_v37  ;;  %2889 = vmatprep.subr.bf16.mxu1 %v3034_v24  ;;  %v1858_v11 = vmax.f32 %v3689_v7, 0.0  ;;  %v3037_v37 = vld [vmem:[%s3771_s7 + $0x30] sm:$0xff]  }
 0x807   : > { %2920 = vmatpush3.bf16.msra.mxu0 %v3045_v8 }
 0x808   : > { %v1859_v13 = vmax.f32 %v3692_v19, 0.0  ;;  %2921 = vmatprep.subr.bf16.mxu0 %v3046_v59 }
 0x809   : > { %2890 = vmatpush3.bf16.msra.mxu1 %v3034_v24 }
 0x80a   : > { %v1863_v14 = vpack.c.bf16 %v1859_v13, %v1858_v11  ;;  %2891 = vmatprep.subr.bf16.mxu1 %v3035_v22 }
 0x80b   : > { %2922 = vmatpush3.bf16.msra.mxu0 %v3046_v59 }
 0x80c   : > { %2880 = vmatmul.mubr.bf16.gmra.mrb[44].mxu1 %v1863_v14 }
 0x80d   : > { %2892 = vmatpush3.bf16.msra.mxu1 %v3035_v22 }
 0x80e   : > { %2893 = vmatprep.subr.bf16.mxu1 %v3036_v45 }
 0x811   : > { %2894 = vmatpush3.bf16.msra.mxu1 %v3036_v45 }
 0x812   : > { %2895 = vmatprep.subr.bf16.mxu1 %v3037_v37 }
 0x815   : > { %2896 = vmatpush3.bf16.msra.mxu1 %v3037_v37 }
 0x816   : > { %2897 = vmatprep.subr.bf16.mxu1 %v3038_v30 }
 0x819   : > { %2898 = vmatpush3.bf16.msra.mxu1 %v3038_v30 }
 0x8cf   : > { %v2877_v43 = vpop.f32.mrb[40].mxu1 }
 0x8d0   : > { %v1980_v32 = vadd.f32 %v2877_v43, %v2629_v46  ;;  %v1971_v38 = vpop.f32.mrb[41].mxu1 }
 0x8d1   : > { %v1972_v26 = vadd.f32 %v2629_v46, %v1971_v38  ;;  %v2878_v50 = vpop.f32.mrb[42].mxu1 }
 0x8d2   : > { %v1983_v49 = vadd.f32 %v2878_v50, %v2629_v46  ;;  %v1974_v41 = vpop.f32.mrb[43].mxu1  ;;  %v2004_v40 = vmax.f32 %v1980_v32, 0.0 }
 0x8d3   : > { %v1975_v29 = vadd.f32 %v2629_v46, %v1974_v41  ;;  %v2002_v58 = vmax.f32 %v1972_v26, 0.0 }
 0x8d4   : > { %v2005_v55 = vmax.f32 %v1983_v49, 0.0 }
 0x8d5   : > { %v2003_v36 = vmax.f32 %v1975_v29, 0.0 }
 0x8d6   : > { %v2011_v6 = vpack.c.bf16 %v2005_v55, %v2004_v40 }
 0x8d7   : > { %v2010_v2 = vpack.c.bf16 %v2003_v36, %v2002_v58 }
 0x8d9   : > { %2899 = vmatprep.mubr.bf16.mxu1 %v2010_v2 }
 0x8da   : > { %2900 = vmatmul.mubr.bf16.vlgmr.msra.gmra.mrb[48].mxu1 %v2011_v6 }
 0x8df   : > { %v2881_v18 = vpop.f32.mrb[44].mxu1 }
 0x8e0   : > { %v1996_v42 = vadd.f32 %v2881_v18, %v2629_v46  ;;  %v1987_v60 = vpop.f32.mrb[45].mxu1 }
 0x8e1   : > { %v1988_v44 = vadd.f32 %v2629_v46, %v1987_v60  ;;  %v2882_v4 = vpop.f32.mrb[46].mxu1 }
 0x8e2   : > { %v1999_v0 = vadd.f32 %v2882_v4, %v2629_v46  ;;  %v1990_v48 = vpop.f32.mrb[47].mxu1  ;;  %v2008_v27 = vmax.f32 %v1996_v42, 0.0 }
 0x8e3   : > { %v1991_v62 = vadd.f32 %v2629_v46, %v1990_v48  ;;  %v2006_v16 = vmax.f32 %v1988_v44, 0.0 }
 0x8e4   : > { %v2009_v51 = vmax.f32 %v1999_v0, 0.0 }
 0x8e5   : > { %v2007_v52 = vmax.f32 %v1991_v62, 0.0 }
 0x8e6   : > { %v2013_v53 = vpack.c.bf16 %v2009_v51, %v2008_v27 }
 0x8e7   : > { %v2012_v54 = vpack.c.bf16 %v2007_v52, %v2006_v16 }
 0x8e9   : > { %2903 = vmatprep.mubr.bf16.mxu1 %v2012_v54 }
 0x8ea   : > { %2904 = vmatmul.mubr.bf16.gmra.mrb[52].mxu1 %v2013_v53 }
 0x9ad   : > { %v2901_v25 = vpop.f32.mrb[48].mxu1 }
 0x9ae   : > { %v2128_v63 = vadd.f32 %v2901_v25, %v2638_v61  ;;  %v2119_v1 = vpop.f32.mrb[49].mxu1 }
 0x9af   : > { %v2120_v3 = vadd.f32 %v2638_v61, %v2119_v1  ;;  %v2902_v20 = vpop.f32.mrb[50].mxu1 }
 0x9b0   : > { %v2152_v28 = vadd.f32 %v2128_v63, %v3664_v47  ;;  %v2131_v33 = vadd.f32 %v2902_v20, %v2638_v61  ;;  %v2122_v24 = vpop.f32.mrb[51].mxu1 }
 0x9b1   : > { %v2150_v5 = vadd.f32 %v2120_v3, %v3656_v35  ;;  %v2123_v10 = vadd.f32 %v2638_v61, %v2122_v24 }
 0x9b2   : > { %v2153_v9 = vadd.f32 %v2131_v33, %v3667_v15  ;;  %v2160_v11 = vmax.f32 %v2152_v28, 0.0 }
 0x9b3   : > { %v2151_v22 = vadd.f32 %v2123_v10, %v3659_v39  ;;  %v2158_v14 = vmax.f32 %v2150_v5, 0.0 }
 0x9b4   : > { %v2161_v13 = vmax.f32 %v2153_v9, 0.0 }
 0x9b5   : > { %v2159_v45 = vmax.f32 %v2151_v22, 0.0 }
 0x9b6   : > { %v2167_v37 = vpack.c.bf16 %v2161_v13, %v2160_v11 }
 0x9b7   : > { %v2166_v30 = vpack.c.bf16 %v2159_v45, %v2158_v14 }
 0x9b9   : > { %2923 = vmatprep.mubr.bf16.mxu0 %v2166_v30 }
 0x9ba   : > { %2924 = vmatmul.mubr.bf16.vlgmr.msra.gmra.mrb[64].mxu0 %v2167_v37 }
 0x9bd   : > { %v2905_v17 = vpop.f32.mrb[52].mxu1 }
 0x9be   : > { %v2144_v31 = vadd.f32 %v2905_v17, %v2638_v61  ;;  %v2135_v47 = vpop.f32.mrb[53].mxu1 }
 0x9bf   : > { %v2136_v34 = vadd.f32 %v2638_v61, %v2135_v47  ;;  %v2906_v21 = vpop.f32.mrb[54].mxu1 }
 0x9c0   : > { %v2156_v35 = vadd.f32 %v2144_v31, %v3689_v7  ;;  %v2147_v23 = vadd.f32 %v2906_v21, %v2638_v61  ;;  %v2138_v15 = vpop.f32.mrb[55].mxu1  ;;  %v2647_v7 = vld [vmem:[%s3774_s10] ss:$0 sm:$0xff] }
 0x9c1   : > { %v2154_v39 = vadd.f32 %v2136_v34, %v3675_v57  ;;  %v2139_v46 = vadd.f32 %v2638_v61, %v2138_v15 }
 0x9c2   : > { %v2157_v43 = vadd.f32 %v2147_v23, %v3692_v19  ;;  %v2164_v38 = vmax.f32 %v2156_v35, 0.0 }
 0x9c3   : > { %v2155_v32 = vadd.f32 %v2139_v46, %v3678_v12  ;;  %v2162_v50 = vmax.f32 %v2154_v39, 0.0 }
 0x9c4   : > { %v2165_v26 = vmax.f32 %v2157_v43, 0.0 }
 0x9c5   : > { %v2163_v49 = vmax.f32 %v2155_v32, 0.0 }
 0x9c6   : > { %v2169_v41 = vpack.c.bf16 %v2165_v26, %v2164_v38 }
 0x9c7   : > { %v2168_v29 = vpack.c.bf16 %v2163_v49, %v2162_v50 }
 0x9c9   : > { %2927 = vmatprep.mubr.bf16.mxu0 %v2168_v29 }
 0x9ca   : > { %2928 = vmatmul.mubr.bf16.gmra.mrb[68].mxu0 %v2169_v41 }
 0xa8d   : > { %v2925_v57 = vpop.f32.mrb[64].mxu0 }
 0xa8e   : > { %v2284_v12 = vadd.f32 %v2925_v57, %v2647_v7  ;;  %v2275_v19 = vpop.f32.mrb[65].mxu0 }
 0xa8f   : > { %v2276_v40 = vadd.f32 %v2647_v7, %v2275_v19  ;;  %v2926_v55 = vpop.f32.mrb[66].mxu0 }
 0xa90   : > { %2309 = vst.msk [vmem:[%s388_s26 + $0x10] sm:$0xff] %vm2306_vm1, %v2284_v12  ;;  %v2287_v58 = vadd.f32 %v2926_v55, %v2647_v7  ;;  %v2278_v36 = vpop.f32.mrb[67].mxu0 }
 0xa91   : > { %2307 = vst.msk [vmem:[%s388_s26] sm:$0xff] %vm2306_vm1, %v2276_v40  ;;  %v2279_v6 = vadd.f32 %v2647_v7, %v2278_v36 }
 0xa92   : > { %2310 = vst.msk [vmem:[%s388_s26 + $0x18] sm:$0xff] %vm2306_vm1, %v2287_v58 }
 0xa93   : > { %2308 = vst.msk [vmem:[%s388_s26 + $0x8] sm:$0xff] %vm2306_vm1, %v2279_v6 }
 0xa9d   : > { %v2929_v2 = vpop.f32.mrb[68].mxu0 }
 0xa9e   : > { %v2300_v18 = vadd.f32 %v2929_v2, %v2647_v7  ;;  %v2291_v42 = vpop.f32.mrb[69].mxu0 }
 0xa9f   : > { %v2292_v60 = vadd.f32 %v2647_v7, %v2291_v42  ;;  %v2930_v44 = vpop.f32.mrb[70].mxu0 }
 0xaa0   : > { %2313 = vst.msk [vmem:[%s388_s26 + $0x30] sm:$0xff] %vm2306_vm1, %v2300_v18  ;;  %v2303_v4 = vadd.f32 %v2930_v44, %v2647_v7  ;;  %v2294_v0 = vpop.f32.mrb[71].mxu0 }
 0xaa1   : > { %2311 = vst.msk [vmem:[%s388_s26 + $0x20] sm:$0xff] %vm2306_vm1, %v2292_v60  ;;  %v2295_v48 = vadd.f32 %v2647_v7, %v2294_v0 }
 0xaa2   : > { %2314 = vst.msk [vmem:[%s388_s26 + $0x38] sm:$0xff] %vm2306_vm1, %v2303_v4 }
 0xaa3   : > { %2312 = vst.msk [vmem:[%s388_s26 + $0x28] sm:$0xff] %vm2306_vm1, %v2295_v48 }
 0xaa4 PF: > { %s21_s17 = sadd.s32 1, %s3057_s17  }
 0xaa5   : > { %p18_p4 = scmp.ge.s32.totalorder %s21_s17, 4  }
 0xaa7   :  { %20 = sbr.rel (!%p18_p4) target bundleno = 1 (0x1), region = 108 }

</bundles_post_ra>
